<compile_context>
chip_gen: v6e
topology: v6e:2x2x1
jax: 0.10.0
libtpu: 0.0.40
codegen_flags: <defaults>
</compile_context>

<pallas_src>
import functools

import jax
import jax.numpy as jnp
from jax.experimental import pallas as pl
from jax.experimental.pallas import tpu as pltpu

BN_EPS = 1e-5
NEG_SLOPE = 0.2
LANE = 128
DEFAULT_TM = 256

# Layer configs: (kernel, stride, padding) per Conv2d of the Discriminator.
_LAYER_CFG = ((4, 2, 1), (4, 2, 1), (4, 2, 1), (4, 2, 1), (4, 1, 0))


def _round_up(x, m):
    return (x + m - 1) // m * m


# ----------------------------- Pallas kernels ------------------------------


def _gemm_lrelu_kernel(p_ref, w_ref, o_ref):
    """im2col conv GEMM (bf16 in, fp32 acc) + LeakyReLU(0.2). No BatchNorm."""
    acc = jnp.dot(p_ref[...], w_ref[...], preferred_element_type=jnp.float32)
    o_ref[...] = jnp.where(acc >= 0.0, acc, NEG_SLOPE * acc).astype(o_ref.dtype)


def _gemm_stats_kernel(p_ref, w_ref, y_ref, s_ref, q_ref):
    """im2col conv GEMM + per-tile partial BatchNorm statistics (sum, sum^2)."""
    acc = jnp.dot(p_ref[...], w_ref[...], preferred_element_type=jnp.float32)
    y_ref[...] = acc
    s_ref[...] = jnp.sum(acc, axis=0, keepdims=True)[None]          # (1,1,Cpad)
    q_ref[...] = jnp.sum(acc * acc, axis=0, keepdims=True)[None]    # (1,1,Cpad)


def _bn_lrelu_kernel(y_ref, sc_ref, sh_ref, o_ref):
    """Affine BatchNorm (precomputed scale/shift) + LeakyReLU(0.2)."""
    z = y_ref[...] * sc_ref[...] + sh_ref[...]
    o_ref[...] = jnp.where(z >= 0.0, z, NEG_SLOPE * z).astype(o_ref.dtype)


def _gemm_sigmoid_kernel(p_ref, w_ref, o_ref):
    """Final im2col conv GEMM + Sigmoid."""
    acc = jnp.dot(p_ref[...], w_ref[...], preferred_element_type=jnp.float32)
    o_ref[...] = 1.0 / (1.0 + jnp.exp(-acc))


# ------------------------- pallas_call wrappers -----------------------------


def _gemm_act(kernel, pmat, w_mat, tm, out_dtype):
    mpad, kpad = pmat.shape
    cpad = w_mat.shape[1]
    return pl.pallas_call(
        kernel,
        out_shape=jax.ShapeDtypeStruct((mpad, cpad), out_dtype),
        grid=(mpad // tm,),
        in_specs=[
            pl.BlockSpec((tm, kpad), lambda i: (i, 0)),
            pl.BlockSpec((kpad, cpad), lambda i: (0, 0)),
        ],
        out_specs=pl.BlockSpec((tm, cpad), lambda i: (i, 0)),
        compiler_params=pltpu.CompilerParams(dimension_semantics=("parallel",)),
    )(pmat, w_mat)


def conv_lrelu(pmat, w_mat, tm):
    return _gemm_act(_gemm_lrelu_kernel, pmat, w_mat, tm, jnp.bfloat16)


def conv_sigmoid(pmat, w_mat, tm):
    return _gemm_act(_gemm_sigmoid_kernel, pmat, w_mat, tm, jnp.float32)


def conv_gemm_stats(pmat, w_mat, tm):
    mpad, kpad = pmat.shape
    cpad = w_mat.shape[1]
    n_tiles = mpad // tm
    return pl.pallas_call(
        _gemm_stats_kernel,
        out_shape=(
            jax.ShapeDtypeStruct((mpad, cpad), jnp.float32),
            jax.ShapeDtypeStruct((n_tiles, 1, cpad), jnp.float32),
            jax.ShapeDtypeStruct((n_tiles, 1, cpad), jnp.float32),
        ),
        grid=(n_tiles,),
        in_specs=[
            pl.BlockSpec((tm, kpad), lambda i: (i, 0)),
            pl.BlockSpec((kpad, cpad), lambda i: (0, 0)),
        ],
        out_specs=(
            pl.BlockSpec((tm, cpad), lambda i: (i, 0)),
            pl.BlockSpec((1, 1, cpad), lambda i: (i, 0, 0)),
            pl.BlockSpec((1, 1, cpad), lambda i: (i, 0, 0)),
        ),
        compiler_params=pltpu.CompilerParams(dimension_semantics=("parallel",)),
    )(pmat, w_mat)


def bn_lrelu(y, scale, shift, tm):
    mpad, cpad = y.shape
    return pl.pallas_call(
        _bn_lrelu_kernel,
        out_shape=jax.ShapeDtypeStruct((mpad, cpad), jnp.bfloat16),
        grid=(mpad // tm,),
        in_specs=[
            pl.BlockSpec((tm, cpad), lambda i: (i, 0)),
            pl.BlockSpec((1, cpad), lambda i: (0, 0)),
            pl.BlockSpec((1, cpad), lambda i: (0, 0)),
        ],
        out_specs=pl.BlockSpec((tm, cpad), lambda i: (i, 0)),
        compiler_params=pltpu.CompilerParams(dimension_semantics=("parallel",)),
    )(y, scale, shift)


# ------------------------------- JAX glue -----------------------------------


def _im2col(x_nhwc, k, stride, pad):
    """im2col for a standard Conv2d(k, stride, pad). Column order (kh, kw, ci).
    Returns ((M, k*k*Cin), (N, OH, OW))."""
    n, h, w, c = x_nhwc.shape
    xp = jnp.pad(x_nhwc, ((0, 0), (pad, pad), (pad, pad), (0, 0)))
    oh = (h + 2 * pad - k) // stride + 1
    ow = (w + 2 * pad - k) // stride + 1
    cols = [
        xp[:, kh:kh + stride * (oh - 1) + 1:stride,
           kw:kw + stride * (ow - 1) + 1:stride, :]
        for kh in range(k) for kw in range(k)
    ]
    patches = jnp.concatenate(cols, axis=-1)  # (N, OH, OW, k*k*C)
    return patches.reshape(n * oh * ow, k * k * c), (n, oh, ow)


def make_discriminator_cfg(ndf, nc):
    chans = (nc, ndf, ndf * 2, ndf * 4, ndf * 8, 1)
    cfg = []
    for i in range(5):
        k, s, p = _LAYER_CFG[i]
        cfg.append((k, s, p, chans[i], chans[i + 1], i in (1, 2, 3)))
    return tuple(cfg)


def init_discriminator_params(key, ndf, nc):
    """DCGAN-style synthetic parameters, pre-laid-out for the Pallas GEMMs:
    conv weight (Cout,Cin,k,k) N(0,0.02) -> (Kpad, Cpad) bf16 matmul matrix;
    BatchNorm gamma=1 / beta=0 (PyTorch defaults), zero-padded to Cpad."""
    cfg = make_discriminator_cfg(ndf, nc)
    params = []
    for i, (k, _s, _p, cin, cout, has_bn) in enumerate(cfg):
        kk = jax.random.fold_in(key, i)
        w = 0.02 * jax.random.normal(kk, (cout, cin, k, k), dtype=jnp.float32)
        # (Cout,Cin,kh,kw) -> (kh,kw,Cin,Cout) -> (K, Cout), matching im2col cols.
        w_mat = jnp.transpose(w, (2, 3, 1, 0)).reshape(k * k * cin, cout)
        kpad = _round_up(k * k * cin, LANE)
        cpad = _round_up(cout, LANE)
        w_mat = jnp.pad(w_mat, ((0, kpad - k * k * cin), (0, cpad - cout)))
        w_mat = w_mat.astype(jnp.bfloat16)
        if has_bn:
            gamma = jnp.pad(jnp.ones((cout,), jnp.float32), (0, cpad - cout))
            beta = jnp.zeros((cpad,), jnp.float32)
            params.append((w_mat, gamma, beta))
        else:
            params.append((w_mat,))
    return params, cfg


@functools.partial(jax.jit, static_argnames=("cfg",))
def discriminator_forward(x_nchw, params, cfg):
    """Forward pass of the DCGAN Discriminator. Input NCHW, output shape (N,)
    (matching `output.view(-1, 1).squeeze(1)`). BatchNorm uses training-mode
    batch statistics (biased variance), like the PyTorch module in train()."""
    x = jnp.transpose(x_nchw, (0, 2, 3, 1)).astype(jnp.bfloat16)  # NHWC, bf16
    n_layers = len(cfg)
    for i, (k, s, p, _cin, cout, has_bn) in enumerate(cfg):
        patches, (n, oh, ow) = _im2col(x, k, s, p)
        m, kdim = patches.shape
        w_mat = params[i][0]
        kpad, _cpad = w_mat.shape
        tm = DEFAULT_TM if m >= DEFAULT_TM else _round_up(m, 16)
        mpad = _round_up(m, tm)
        pmat = jnp.pad(patches.astype(jnp.bfloat16),
                       ((0, mpad - m), (0, kpad - kdim)))
        if has_bn:
            _, gamma, beta = params[i]
            y, psum, psq = conv_gemm_stats(pmat, w_mat, tm)
            # Cross-tile reduction of the partial stats (tiny, done in fp32).
            mean = jnp.sum(psum, axis=(0, 1)) / m
            var = jnp.sum(psq, axis=(0, 1)) / m - mean * mean  # E[y^2]-mean^2
            inv = jax.lax.rsqrt(var + BN_EPS)
            scale = (gamma * inv)[None, :]
            shift = (beta - mean * gamma * inv)[None, :]
            act = bn_lrelu(y, scale, shift, tm)                 # bf16
        elif i < n_layers - 1:
            act = conv_lrelu(pmat, w_mat, tm)                   # bf16
        else:
            act = conv_sigmoid(pmat, w_mat, tm)                 # fp32
        x = act[:m, :cout].reshape(n, oh, ow, cout)
    # x: (N, 1, 1, 1) -> (N,)
    return x.reshape(-1).astype(jnp.float32)


if __name__ == "__main__":
    # Small, module-consistent shapes: nc=3, ndf=8, batch=2, 64x64 input
    # (64x64 is required so the final 4x4/stride-1 conv reduces to 1x1).
    ndf, nc, batch = 8, 3, 2

    key = jax.random.PRNGKey(0)
    x = jax.random.normal(jax.random.fold_in(key, 1),
                          (batch, nc, 64, 64), dtype=jnp.float32)
    params, cfg = init_discriminator_params(jax.random.fold_in(key, 2), ndf, nc)

    out = discriminator_forward(x, params, cfg=cfg)
    out = jax.block_until_ready(out)

    assert out.shape == (batch,), out.shape
    assert bool(jnp.all(jnp.isfinite(out)))
    assert bool(jnp.all((out >= 0.0) & (out <= 1.0)))
    print("KERNEL_OK")
</pallas_src>

<mosaic_0001>
module attributes {stable_mosaic.version = 11 : i64} {
  func.func @_gemm_lrelu_kernel(%arg0: i32, %arg1: memref<256x128xbf16, #tpu.memory_space<vmem>>, %arg2: memref<128x128xbf16, #tpu.memory_space<vmem>>, %arg3: memref<256x128xbf16, #tpu.memory_space<vmem>>) attributes {dimension_semantics = [#tpu.dimension_semantics<parallel>], iteration_bounds = array<i64: 8>, scalar_prefetch = 0 : i64, scratch_operands = 0 : i64, tpu.core_type = #tpu.core_type<tc>, window_params = [{transform_indices = @transform_0, window_bounds = array<i64: 256, 128>}, {pipeline_mode = #tpu.pipeline_mode<synchronous>, transform_indices = @transform_1, window_bounds = array<i64: 128, 128>}, {transform_indices = @transform_2, window_bounds = array<i64: 256, 128>}]} {
    %c0 = arith.constant 0 : index
    %c0_0 = arith.constant 0 : index
    %0 = vector.load %arg1[%c0, %c0_0] : memref<256x128xbf16, #tpu.memory_space<vmem>>, vector<256x128xbf16>
    %c0_1 = arith.constant 0 : index
    %c0_2 = arith.constant 0 : index
    %1 = vector.load %arg2[%c0_1, %c0_2] : memref<128x128xbf16, #tpu.memory_space<vmem>>, vector<128x128xbf16>
    %cst = arith.constant dense<0.000000e+00> : vector<256x128xf32>
    %2 = tpu.matmul %0, %1, %cst {dimension_numbers = #tpu.dot_dimension_numbers<[1], [0], [0], [1], [0, 0, 1, 1], [], []>} : vector<256x128xbf16>, vector<128x128xbf16>, vector<256x128xf32> -> vector<256x128xf32>
    %cst_3 = arith.constant 0.000000e+00 : f32
    %3 = vector.broadcast %cst_3 : f32 to vector<256x128xf32>
    %4 = arith.cmpf oge, %2, %3 : vector<256x128xf32>
    %cst_4 = arith.constant 2.000000e-01 : f32
    %5 = vector.broadcast %cst_4 : f32 to vector<256x128xf32>
    %6 = arith.mulf %5, %2 : vector<256x128xf32>
    %7 = arith.select %4, %2, %6 : vector<256x128xi1>, vector<256x128xf32>
    %8 = arith.truncf %7 : vector<256x128xf32> to vector<256x128xbf16>
    %c0_5 = arith.constant 0 : index
    %c0_6 = arith.constant 0 : index
    %9 = vector.load %arg3[%c0_5, %c0_6] : memref<256x128xbf16, #tpu.memory_space<vmem>>, vector<256x128xbf16>
    tpu.vector_store %arg3[%c0_5, %c0_6], %8 {strides = array<i32>} : memref<256x128xbf16, #tpu.memory_space<vmem>>, vector<256x128xbf16>,
    return
  }
  func.func @transform_0(%arg0: i32) -> (i32, i32) {
    %c0_i32 = arith.constant 0 : i32
    %c0_i32_0 = arith.constant 0 : i32
    return %arg0, %c0_i32 : i32, i32
  }
  func.func @transform_1(%arg0: i32) -> (i32, i32) {
    %c0_i32 = arith.constant 0 : i32
    %c0_i32_0 = arith.constant 0 : i32
    %c0_i32_1 = arith.constant 0 : i32
    return %c0_i32, %c0_i32_0 : i32, i32
  }
  func.func @transform_2(%arg0: i32) -> (i32, i32) {
    %c0_i32 = arith.constant 0 : i32
    %c0_i32_0 = arith.constant 0 : i32
    return %arg0, %c0_i32 : i32, i32
  }
}

module attributes {stable_mosaic.version = 11 : i64} {
  func.func @_bn_lrelu_kernel(%arg0: i32, %arg1: memref<256x128xf32, #tpu.memory_space<vmem>>, %arg2: memref<1x128xf32, #tpu.memory_space<vmem>>, %arg3: memref<1x128xf32, #tpu.memory_space<vmem>>, %arg4: memref<256x128xbf16, #tpu.memory_space<vmem>>) attributes {dimension_semantics = [#tpu.dimension_semantics<parallel>], iteration_bounds = array<i64: 2>, scalar_prefetch = 0 : i64, scratch_operands = 0 : i64, tpu.core_type = #tpu.core_type<tc>, window_params = [{transform_indices = @transform_0, window_bounds = array<i64: 256, 128>}, {pipeline_mode = #tpu.pipeline_mode<synchronous>, transform_indices = @transform_1, window_bounds = array<i64: 1, 128>}, {pipeline_mode = #tpu.pipeline_mode<synchronous>, transform_indices = @transform_2, window_bounds = array<i64: 1, 128>}, {transform_indices = @transform_3, window_bounds = array<i64: 256, 128>}]} {
    %c0 = arith.constant 0 : index
    %c0_0 = arith.constant 0 : index
    %0 = vector.load %arg1[%c0, %c0_0] : memref<256x128xf32, #tpu.memory_space<vmem>>, vector<256x128xf32>
    %c0_1 = arith.constant 0 : index
    %c0_2 = arith.constant 0 : index
    %1 = vector.load %arg2[%c0_1, %c0_2] : memref<1x128xf32, #tpu.memory_space<vmem>>, vector<1x128xf32>
    %2 = vector.broadcast %1 : vector<1x128xf32> to vector<256x128xf32>
    %3 = arith.mulf %0, %2 : vector<256x128xf32>
    %c0_3 = arith.constant 0 : index
    %c0_4 = arith.constant 0 : index
    %4 = vector.load %arg3[%c0_3, %c0_4] : memref<1x128xf32, #tpu.memory_space<vmem>>, vector<1x128xf32>
    %5 = vector.broadcast %4 : vector<1x128xf32> to vector<256x128xf32>
    %6 = arith.addf %3, %5 : vector<256x128xf32>
    %cst = arith.constant 0.000000e+00 : f32
    %7 = vector.broadcast %cst : f32 to vector<256x128xf32>
    %8 = arith.cmpf oge, %6, %7 : vector<256x128xf32>
    %cst_5 = arith.constant 2.000000e-01 : f32
    %9 = vector.broadcast %cst_5 : f32 to vector<256x128xf32>
    %10 = arith.mulf %9, %6 : vector<256x128xf32>
    %11 = arith.select %8, %6, %10 : vector<256x128xi1>, vector<256x128xf32>
    %12 = arith.truncf %11 : vector<256x128xf32> to vector<256x128xbf16>
    %c0_6 = arith.constant 0 : index
    %c0_7 = arith.constant 0 : index
    %13 = vector.load %arg4[%c0_6, %c0_7] : memref<256x128xbf16, #tpu.memory_space<vmem>>, vector<256x128xbf16>
    tpu.vector_store %arg4[%c0_6, %c0_7], %12 {strides = array<i32>} : memref<256x128xbf16, #tpu.memory_space<vmem>>, vector<256x128xbf16>,
    return
  }
  func.func @transform_0(%arg0: i32) -> (i32, i32) {
    %c0_i32 = arith.constant 0 : i32
    %c0_i32_0 = arith.constant 0 : i32
    return %arg0, %c0_i32 : i32, i32
  }
  func.func @transform_1(%arg0: i32) -> (i32, i32) {
    %c0_i32 = arith.constant 0 : i32
    %c0_i32_0 = arith.constant 0 : i32
    %c0_i32_1 = arith.constant 0 : i32
    return %c0_i32, %c0_i32_0 : i32, i32
  }
  func.func @transform_2(%arg0: i32) -> (i32, i32) {
    %c0_i32 = arith.constant 0 : i32
    %c0_i32_0 = arith.constant 0 : i32
    %c0_i32_1 = arith.constant 0 : i32
    return %c0_i32, %c0_i32_0 : i32, i32
  }
  func.func @transform_3(%arg0: i32) -> (i32, i32) {
    %c0_i32 = arith.constant 0 : i32
    %c0_i32_0 = arith.constant 0 : i32
    return %arg0, %c0_i32 : i32, i32
  }
}

module attributes {stable_mosaic.version = 11 : i64} {
  func.func @_gemm_stats_kernel(%arg0: i32, %arg1: memref<256x128xbf16, #tpu.memory_space<vmem>>, %arg2: memref<128x128xbf16, #tpu.memory_space<vmem>>, %arg3: memref<256x128xf32, #tpu.memory_space<vmem>>, %arg4: memref<1x1x128xf32, #tpu.memory_space<vmem>>, %arg5: memref<1x1x128xf32, #tpu.memory_space<vmem>>) attributes {dimension_semantics = [#tpu.dimension_semantics<parallel>], iteration_bounds = array<i64: 2>, scalar_prefetch = 0 : i64, scratch_operands = 0 : i64, tpu.core_type = #tpu.core_type<tc>, window_params = [{transform_indices = @transform_0, window_bounds = array<i64: 256, 128>}, {pipeline_mode = #tpu.pipeline_mode<synchronous>, transform_indices = @transform_1, window_bounds = array<i64: 128, 128>}, {transform_indices = @transform_2, window_bounds = array<i64: 256, 128>}, {transform_indices = @transform_3, window_bounds = array<i64: 1, 1, 128>}, {transform_indices = @transform_4, window_bounds = array<i64: 1, 1, 128>}]} {
    %c0 = arith.constant 0 : index
    %c0_0 = arith.constant 0 : index
    %0 = vector.load %arg1[%c0, %c0_0] : memref<256x128xbf16, #tpu.memory_space<vmem>>, vector<256x128xbf16>
    %c0_1 = arith.constant 0 : index
    %c0_2 = arith.constant 0 : index
    %1 = vector.load %arg2[%c0_1, %c0_2] : memref<128x128xbf16, #tpu.memory_space<vmem>>, vector<128x128xbf16>
    %cst = arith.constant dense<0.000000e+00> : vector<256x128xf32>
    %2 = tpu.matmul %0, %1, %cst {dimension_numbers = #tpu.dot_dimension_numbers<[1], [0], [0], [1], [0, 0, 1, 1], [], []>} : vector<256x128xbf16>, vector<128x128xbf16>, vector<256x128xf32> -> vector<256x128xf32>
    %c0_3 = arith.constant 0 : index
    %c0_4 = arith.constant 0 : index
    %3 = vector.load %arg3[%c0_3, %c0_4] : memref<256x128xf32, #tpu.memory_space<vmem>>, vector<256x128xf32>
    tpu.vector_store %arg3[%c0_3, %c0_4], %2 {strides = array<i32>} : memref<256x128xf32, #tpu.memory_space<vmem>>, vector<256x128xf32>,
    %cst_5 = arith.constant dense<0.000000e+00> : vector<128xf32>
    %4 = vector.multi_reduction <add>, %2, %cst_5 [0] : vector<256x128xf32> to vector<128xf32>
    %5 = vector.shape_cast %4 : vector<128xf32> to vector<1x128xf32>
    %6 = vector.shape_cast %5 : vector<1x128xf32> to vector<1x1x128xf32>
    %c0_6 = arith.constant 0 : index
    %c0_7 = arith.constant 0 : index
    %c0_8 = arith.constant 0 : index
    %7 = vector.load %arg4[%c0_6, %c0_7, %c0_8] : memref<1x1x128xf32, #tpu.memory_space<vmem>>, vector<1x1x128xf32>
    tpu.vector_store %arg4[%c0_6, %c0_7, %c0_8], %6 {strides = array<i32>} : memref<1x1x128xf32, #tpu.memory_space<vmem>>, vector<1x1x128xf32>,
    %8 = arith.mulf %2, %2 : vector<256x128xf32>
    %cst_9 = arith.constant dense<0.000000e+00> : vector<128xf32>
    %9 = vector.multi_reduction <add>, %8, %cst_9 [0] : vector<256x128xf32> to vector<128xf32>
    %10 = vector.shape_cast %9 : vector<128xf32> to vector<1x128xf32>
    %11 = vector.shape_cast %10 : vector<1x128xf32> to vector<1x1x128xf32>
    %c0_10 = arith.constant 0 : index
    %c0_11 = arith.constant 0 : index
    %c0_12 = arith.constant 0 : index
    %12 = vector.load %arg5[%c0_10, %c0_11, %c0_12] : memref<1x1x128xf32, #tpu.memory_space<vmem>>, vector<1x1x128xf32>
    tpu.vector_store %arg5[%c0_10, %c0_11, %c0_12], %11 {strides = array<i32>} : memref<1x1x128xf32, #tpu.memory_space<vmem>>, vector<1x1x128xf32>,
    return
  }
  func.func @transform_0(%arg0: i32) -> (i32, i32) {
    %c0_i32 = arith.constant 0 : i32
    %c0_i32_0 = arith.constant 0 : i32
    return %arg0, %c0_i32 : i32, i32
  }
  func.func @transform_1(%arg0: i32) -> (i32, i32) {
    %c0_i32 = arith.constant 0 : i32
    %c0_i32_0 = arith.constant 0 : i32
    %c0_i32_1 = arith.constant 0 : i32
    return %c0_i32, %c0_i32_0 : i32, i32
  }
  func.func @transform_2(%arg0: i32) -> (i32, i32) {
    %c0_i32 = arith.constant 0 : i32
    %c0_i32_0 = arith.constant 0 : i32
    return %arg0, %c0_i32 : i32, i32
  }
  func.func @transform_3(%arg0: i32) -> (i32, i32, i32) {
    %c0_i32 = arith.constant 0 : i32
    %c0_i32_0 = arith.constant 0 : i32
    %c0_i32_1 = arith.constant 0 : i32
    return %arg0, %c0_i32, %c0_i32_0 : i32, i32, i32
  }
  func.func @transform_4(%arg0: i32) -> (i32, i32, i32) {
    %c0_i32 = arith.constant 0 : i32
    %c0_i32_0 = arith.constant 0 : i32
    %c0_i32_1 = arith.constant 0 : i32
    return %arg0, %c0_i32, %c0_i32_0 : i32, i32, i32
  }
}

module attributes {stable_mosaic.version = 11 : i64} {
  func.func @_gemm_stats_kernel(%arg0: i32, %arg1: memref<128x256xbf16, #tpu.memory_space<vmem>>, %arg2: memref<256x128xbf16, #tpu.memory_space<vmem>>, %arg3: memref<128x128xf32, #tpu.memory_space<vmem>>, %arg4: memref<1x1x128xf32, #tpu.memory_space<vmem>>, %arg5: memref<1x1x128xf32, #tpu.memory_space<vmem>>) attributes {dimension_semantics = [#tpu.dimension_semantics<parallel>], iteration_bounds = array<i64: 1>, scalar_prefetch = 0 : i64, scratch_operands = 0 : i64, tpu.core_type = #tpu.core_type<tc>, window_params = [{transform_indices = @transform_0, window_bounds = array<i64: 128, 256>}, {pipeline_mode = #tpu.pipeline_mode<synchronous>, transform_indices = @transform_1, window_bounds = array<i64: 256, 128>}, {transform_indices = @transform_2, window_bounds = array<i64: 128, 128>}, {transform_indices = @transform_3, window_bounds = array<i64: 1, 1, 128>}, {transform_indices = @transform_4, window_bounds = array<i64: 1, 1, 128>}]} {
    %c0 = arith.constant 0 : index
    %c0_0 = arith.constant 0 : index
    %0 = vector.load %arg1[%c0, %c0_0] : memref<128x256xbf16, #tpu.memory_space<vmem>>, vector<128x256xbf16>
    %c0_1 = arith.constant 0 : index
    %c0_2 = arith.constant 0 : index
    %1 = vector.load %arg2[%c0_1, %c0_2] : memref<256x128xbf16, #tpu.memory_space<vmem>>, vector<256x128xbf16>
    %cst = arith.constant dense<0.000000e+00> : vector<128x128xf32>
    %2 = tpu.matmul %0, %1, %cst {dimension_numbers = #tpu.dot_dimension_numbers<[1], [0], [0], [1], [0, 0, 1, 1], [], []>} : vector<128x256xbf16>, vector<256x128xbf16>, vector<128x128xf32> -> vector<128x128xf32>
    %c0_3 = arith.constant 0 : index
    %c0_4 = arith.constant 0 : index
    %3 = vector.load %arg3[%c0_3, %c0_4] : memref<128x128xf32, #tpu.memory_space<vmem>>, vector<128x128xf32>
    tpu.vector_store %arg3[%c0_3, %c0_4], %2 {strides = array<i32>} : memref<128x128xf32, #tpu.memory_space<vmem>>, vector<128x128xf32>,
    %cst_5 = arith.constant dense<0.000000e+00> : vector<128xf32>
    %4 = vector.multi_reduction <add>, %2, %cst_5 [0] : vector<128x128xf32> to vector<128xf32>
    %5 = vector.shape_cast %4 : vector<128xf32> to vector<1x128xf32>
    %6 = vector.shape_cast %5 : vector<1x128xf32> to vector<1x1x128xf32>
    %c0_6 = arith.constant 0 : index
    %c0_7 = arith.constant 0 : index
    %c0_8 = arith.constant 0 : index
    %7 = vector.load %arg4[%c0_6, %c0_7, %c0_8] : memref<1x1x128xf32, #tpu.memory_space<vmem>>, vector<1x1x128xf32>
    tpu.vector_store %arg4[%c0_6, %c0_7, %c0_8], %6 {strides = array<i32>} : memref<1x1x128xf32, #tpu.memory_space<vmem>>, vector<1x1x128xf32>,
    %8 = arith.mulf %2, %2 : vector<128x128xf32>
    %cst_9 = arith.constant dense<0.000000e+00> : vector<128xf32>
    %9 = vector.multi_reduction <add>, %8, %cst_9 [0] : vector<128x128xf32> to vector<128xf32>
    %10 = vector.shape_cast %9 : vector<128xf32> to vector<1x128xf32>
    %11 = vector.shape_cast %10 : vector<1x128xf32> to vector<1x1x128xf32>
    %c0_10 = arith.constant 0 : index
    %c0_11 = arith.constant 0 : index
    %c0_12 = arith.constant 0 : index
    %12 = vector.load %arg5[%c0_10, %c0_11, %c0_12] : memref<1x1x128xf32, #tpu.memory_space<vmem>>, vector<1x1x128xf32>
    tpu.vector_store %arg5[%c0_10, %c0_11, %c0_12], %11 {strides = array<i32>} : memref<1x1x128xf32, #tpu.memory_space<vmem>>, vector<1x1x128xf32>,
    return
  }
  func.func @transform_0(%arg0: i32) -> (i32, i32) {
    %c0_i32 = arith.constant 0 : i32
    %c0_i32_0 = arith.constant 0 : i32
    return %arg0, %c0_i32 : i32, i32
  }
  func.func @transform_1(%arg0: i32) -> (i32, i32) {
    %c0_i32 = arith.constant 0 : i32
    %c0_i32_0 = arith.constant 0 : i32
    %c0_i32_1 = arith.constant 0 : i32
    return %c0_i32, %c0_i32_0 : i32, i32
  }
  func.func @transform_2(%arg0: i32) -> (i32, i32) {
    %c0_i32 = arith.constant 0 : i32
    %c0_i32_0 = arith.constant 0 : i32
    return %arg0, %c0_i32 : i32, i32
  }
  func.func @transform_3(%arg0: i32) -> (i32, i32, i32) {
    %c0_i32 = arith.constant 0 : i32
    %c0_i32_0 = arith.constant 0 : i32
    %c0_i32_1 = arith.constant 0 : i32
    return %arg0, %c0_i32, %c0_i32_0 : i32, i32, i32
  }
  func.func @transform_4(%arg0: i32) -> (i32, i32, i32) {
    %c0_i32 = arith.constant 0 : i32
    %c0_i32_0 = arith.constant 0 : i32
    %c0_i32_1 = arith.constant 0 : i32
    return %arg0, %c0_i32, %c0_i32_0 : i32, i32, i32
  }
}

module attributes {stable_mosaic.version = 11 : i64} {
  func.func @_bn_lrelu_kernel(%arg0: i32, %arg1: memref<128x128xf32, #tpu.memory_space<vmem>>, %arg2: memref<1x128xf32, #tpu.memory_space<vmem>>, %arg3: memref<1x128xf32, #tpu.memory_space<vmem>>, %arg4: memref<128x128xbf16, #tpu.memory_space<vmem>>) attributes {dimension_semantics = [#tpu.dimension_semantics<parallel>], iteration_bounds = array<i64: 1>, scalar_prefetch = 0 : i64, scratch_operands = 0 : i64, tpu.core_type = #tpu.core_type<tc>, window_params = [{transform_indices = @transform_0, window_bounds = array<i64: 128, 128>}, {pipeline_mode = #tpu.pipeline_mode<synchronous>, transform_indices = @transform_1, window_bounds = array<i64: 1, 128>}, {pipeline_mode = #tpu.pipeline_mode<synchronous>, transform_indices = @transform_2, window_bounds = array<i64: 1, 128>}, {transform_indices = @transform_3, window_bounds = array<i64: 128, 128>}]} {
    %c0 = arith.constant 0 : index
    %c0_0 = arith.constant 0 : index
    %0 = vector.load %arg1[%c0, %c0_0] : memref<128x128xf32, #tpu.memory_space<vmem>>, vector<128x128xf32>
    %c0_1 = arith.constant 0 : index
    %c0_2 = arith.constant 0 : index
    %1 = vector.load %arg2[%c0_1, %c0_2] : memref<1x128xf32, #tpu.memory_space<vmem>>, vector<1x128xf32>
    %2 = vector.broadcast %1 : vector<1x128xf32> to vector<128x128xf32>
    %3 = arith.mulf %0, %2 : vector<128x128xf32>
    %c0_3 = arith.constant 0 : index
    %c0_4 = arith.constant 0 : index
    %4 = vector.load %arg3[%c0_3, %c0_4] : memref<1x128xf32, #tpu.memory_space<vmem>>, vector<1x128xf32>
    %5 = vector.broadcast %4 : vector<1x128xf32> to vector<128x128xf32>
    %6 = arith.addf %3, %5 : vector<128x128xf32>
    %cst = arith.constant 0.000000e+00 : f32
    %7 = vector.broadcast %cst : f32 to vector<128x128xf32>
    %8 = arith.cmpf oge, %6, %7 : vector<128x128xf32>
    %cst_5 = arith.constant 2.000000e-01 : f32
    %9 = vector.broadcast %cst_5 : f32 to vector<128x128xf32>
    %10 = arith.mulf %9, %6 : vector<128x128xf32>
    %11 = arith.select %8, %6, %10 : vector<128x128xi1>, vector<128x128xf32>
    %12 = arith.truncf %11 : vector<128x128xf32> to vector<128x128xbf16>
    %c0_6 = arith.constant 0 : index
    %c0_7 = arith.constant 0 : index
    %13 = vector.load %arg4[%c0_6, %c0_7] : memref<128x128xbf16, #tpu.memory_space<vmem>>, vector<128x128xbf16>
    tpu.vector_store %arg4[%c0_6, %c0_7], %12 {strides = array<i32>} : memref<128x128xbf16, #tpu.memory_space<vmem>>, vector<128x128xbf16>,
    return
  }
  func.func @transform_0(%arg0: i32) -> (i32, i32) {
    %c0_i32 = arith.constant 0 : i32
    %c0_i32_0 = arith.constant 0 : i32
    return %arg0, %c0_i32 : i32, i32
  }
  func.func @transform_1(%arg0: i32) -> (i32, i32) {
    %c0_i32 = arith.constant 0 : i32
    %c0_i32_0 = arith.constant 0 : i32
    %c0_i32_1 = arith.constant 0 : i32
    return %c0_i32, %c0_i32_0 : i32, i32
  }
  func.func @transform_2(%arg0: i32) -> (i32, i32) {
    %c0_i32 = arith.constant 0 : i32
    %c0_i32_0 = arith.constant 0 : i32
    %c0_i32_1 = arith.constant 0 : i32
    return %c0_i32, %c0_i32_0 : i32, i32
  }
  func.func @transform_3(%arg0: i32) -> (i32, i32) {
    %c0_i32 = arith.constant 0 : i32
    %c0_i32_0 = arith.constant 0 : i32
    return %arg0, %c0_i32 : i32, i32
  }
}

module attributes {stable_mosaic.version = 11 : i64} {
  func.func @_gemm_stats_kernel(%arg0: i32, %arg1: memref<32x512xbf16, #tpu.memory_space<vmem>>, %arg2: memref<512x128xbf16, #tpu.memory_space<vmem>>, %arg3: memref<32x128xf32, #tpu.memory_space<vmem>>, %arg4: memref<1x1x128xf32, #tpu.memory_space<vmem>>, %arg5: memref<1x1x128xf32, #tpu.memory_space<vmem>>) attributes {dimension_semantics = [#tpu.dimension_semantics<parallel>], iteration_bounds = array<i64: 1>, scalar_prefetch = 0 : i64, scratch_operands = 0 : i64, tpu.core_type = #tpu.core_type<tc>, window_params = [{transform_indices = @transform_0, window_bounds = array<i64: 32, 512>}, {pipeline_mode = #tpu.pipeline_mode<synchronous>, transform_indices = @transform_1, window_bounds = array<i64: 512, 128>}, {transform_indices = @transform_2, window_bounds = array<i64: 32, 128>}, {transform_indices = @transform_3, window_bounds = array<i64: 1, 1, 128>}, {transform_indices = @transform_4, window_bounds = array<i64: 1, 1, 128>}]} {
    %c0 = arith.constant 0 : index
    %c0_0 = arith.constant 0 : index
    %0 = vector.load %arg1[%c0, %c0_0] : memref<32x512xbf16, #tpu.memory_space<vmem>>, vector<32x512xbf16>
    %c0_1 = arith.constant 0 : index
    %c0_2 = arith.constant 0 : index
    %1 = vector.load %arg2[%c0_1, %c0_2] : memref<512x128xbf16, #tpu.memory_space<vmem>>, vector<512x128xbf16>
    %cst = arith.constant dense<0.000000e+00> : vector<32x128xf32>
    %2 = tpu.matmul %0, %1, %cst {dimension_numbers = #tpu.dot_dimension_numbers<[1], [0], [0], [1], [0, 0, 1, 1], [], []>} : vector<32x512xbf16>, vector<512x128xbf16>, vector<32x128xf32> -> vector<32x128xf32>
    %c0_3 = arith.constant 0 : index
    %c0_4 = arith.constant 0 : index
    %3 = vector.load %arg3[%c0_3, %c0_4] : memref<32x128xf32, #tpu.memory_space<vmem>>, vector<32x128xf32>
    tpu.vector_store %arg3[%c0_3, %c0_4], %2 {strides = array<i32>} : memref<32x128xf32, #tpu.memory_space<vmem>>, vector<32x128xf32>,
    %cst_5 = arith.constant dense<0.000000e+00> : vector<128xf32>
    %4 = vector.multi_reduction <add>, %2, %cst_5 [0] : vector<32x128xf32> to vector<128xf32>
    %5 = vector.shape_cast %4 : vector<128xf32> to vector<1x128xf32>
    %6 = vector.shape_cast %5 : vector<1x128xf32> to vector<1x1x128xf32>
    %c0_6 = arith.constant 0 : index
    %c0_7 = arith.constant 0 : index
    %c0_8 = arith.constant 0 : index
    %7 = vector.load %arg4[%c0_6, %c0_7, %c0_8] : memref<1x1x128xf32, #tpu.memory_space<vmem>>, vector<1x1x128xf32>
    tpu.vector_store %arg4[%c0_6, %c0_7, %c0_8], %6 {strides = array<i32>} : memref<1x1x128xf32, #tpu.memory_space<vmem>>, vector<1x1x128xf32>,
    %8 = arith.mulf %2, %2 : vector<32x128xf32>
    %cst_9 = arith.constant dense<0.000000e+00> : vector<128xf32>
    %9 = vector.multi_reduction <add>, %8, %cst_9 [0] : vector<32x128xf32> to vector<128xf32>
    %10 = vector.shape_cast %9 : vector<128xf32> to vector<1x128xf32>
    %11 = vector.shape_cast %10 : vector<1x128xf32> to vector<1x1x128xf32>
    %c0_10 = arith.constant 0 : index
    %c0_11 = arith.constant 0 : index
    %c0_12 = arith.constant 0 : index
    %12 = vector.load %arg5[%c0_10, %c0_11, %c0_12] : memref<1x1x128xf32, #tpu.memory_space<vmem>>, vector<1x1x128xf32>
    tpu.vector_store %arg5[%c0_10, %c0_11, %c0_12], %11 {strides = array<i32>} : memref<1x1x128xf32, #tpu.memory_space<vmem>>, vector<1x1x128xf32>,
    return
  }
  func.func @transform_0(%arg0: i32) -> (i32, i32) {
    %c0_i32 = arith.constant 0 : i32
    %c0_i32_0 = arith.constant 0 : i32
    return %arg0, %c0_i32 : i32, i32
  }
  func.func @transform_1(%arg0: i32) -> (i32, i32) {
    %c0_i32 = arith.constant 0 : i32
    %c0_i32_0 = arith.constant 0 : i32
    %c0_i32_1 = arith.constant 0 : i32
    return %c0_i32, %c0_i32_0 : i32, i32
  }
  func.func @transform_2(%arg0: i32) -> (i32, i32) {
    %c0_i32 = arith.constant 0 : i32
    %c0_i32_0 = arith.constant 0 : i32
    return %arg0, %c0_i32 : i32, i32
  }
  func.func @transform_3(%arg0: i32) -> (i32, i32, i32) {
    %c0_i32 = arith.constant 0 : i32
    %c0_i32_0 = arith.constant 0 : i32
    %c0_i32_1 = arith.constant 0 : i32
    return %arg0, %c0_i32, %c0_i32_0 : i32, i32, i32
  }
  func.func @transform_4(%arg0: i32) -> (i32, i32, i32) {
    %c0_i32 = arith.constant 0 : i32
    %c0_i32_0 = arith.constant 0 : i32
    %c0_i32_1 = arith.constant 0 : i32
    return %arg0, %c0_i32, %c0_i32_0 : i32, i32, i32
  }
}

module attributes {stable_mosaic.version = 11 : i64} {
  func.func @_bn_lrelu_kernel(%arg0: i32, %arg1: memref<32x128xf32, #tpu.memory_space<vmem>>, %arg2: memref<1x128xf32, #tpu.memory_space<vmem>>, %arg3: memref<1x128xf32, #tpu.memory_space<vmem>>, %arg4: memref<32x128xbf16, #tpu.memory_space<vmem>>) attributes {dimension_semantics = [#tpu.dimension_semantics<parallel>], iteration_bounds = array<i64: 1>, scalar_prefetch = 0 : i64, scratch_operands = 0 : i64, tpu.core_type = #tpu.core_type<tc>, window_params = [{transform_indices = @transform_0, window_bounds = array<i64: 32, 128>}, {pipeline_mode = #tpu.pipeline_mode<synchronous>, transform_indices = @transform_1, window_bounds = array<i64: 1, 128>}, {pipeline_mode = #tpu.pipeline_mode<synchronous>, transform_indices = @transform_2, window_bounds = array<i64: 1, 128>}, {transform_indices = @transform_3, window_bounds = array<i64: 32, 128>}]} {
    %c0 = arith.constant 0 : index
    %c0_0 = arith.constant 0 : index
    %0 = vector.load %arg1[%c0, %c0_0] : memref<32x128xf32, #tpu.memory_space<vmem>>, vector<32x128xf32>
    %c0_1 = arith.constant 0 : index
    %c0_2 = arith.constant 0 : index
    %1 = vector.load %arg2[%c0_1, %c0_2] : memref<1x128xf32, #tpu.memory_space<vmem>>, vector<1x128xf32>
    %2 = vector.broadcast %1 : vector<1x128xf32> to vector<32x128xf32>
    %3 = arith.mulf %0, %2 : vector<32x128xf32>
    %c0_3 = arith.constant 0 : index
    %c0_4 = arith.constant 0 : index
    %4 = vector.load %arg3[%c0_3, %c0_4] : memref<1x128xf32, #tpu.memory_space<vmem>>, vector<1x128xf32>
    %5 = vector.broadcast %4 : vector<1x128xf32> to vector<32x128xf32>
    %6 = arith.addf %3, %5 : vector<32x128xf32>
    %cst = arith.constant 0.000000e+00 : f32
    %7 = vector.broadcast %cst : f32 to vector<32x128xf32>
    %8 = arith.cmpf oge, %6, %7 : vector<32x128xf32>
    %cst_5 = arith.constant 2.000000e-01 : f32
    %9 = vector.broadcast %cst_5 : f32 to vector<32x128xf32>
    %10 = arith.mulf %9, %6 : vector<32x128xf32>
    %11 = arith.select %8, %6, %10 : vector<32x128xi1>, vector<32x128xf32>
    %12 = arith.truncf %11 : vector<32x128xf32> to vector<32x128xbf16>
    %c0_6 = arith.constant 0 : index
    %c0_7 = arith.constant 0 : index
    %13 = vector.load %arg4[%c0_6, %c0_7] : memref<32x128xbf16, #tpu.memory_space<vmem>>, vector<32x128xbf16>
    tpu.vector_store %arg4[%c0_6, %c0_7], %12 {strides = array<i32>} : memref<32x128xbf16, #tpu.memory_space<vmem>>, vector<32x128xbf16>,
    return
  }
  func.func @transform_0(%arg0: i32) -> (i32, i32) {
    %c0_i32 = arith.constant 0 : i32
    %c0_i32_0 = arith.constant 0 : i32
    return %arg0, %c0_i32 : i32, i32
  }
  func.func @transform_1(%arg0: i32) -> (i32, i32) {
    %c0_i32 = arith.constant 0 : i32
    %c0_i32_0 = arith.constant 0 : i32
    %c0_i32_1 = arith.constant 0 : i32
    return %c0_i32, %c0_i32_0 : i32, i32
  }
  func.func @transform_2(%arg0: i32) -> (i32, i32) {
    %c0_i32 = arith.constant 0 : i32
    %c0_i32_0 = arith.constant 0 : i32
    %c0_i32_1 = arith.constant 0 : i32
    return %c0_i32, %c0_i32_0 : i32, i32
  }
  func.func @transform_3(%arg0: i32) -> (i32, i32) {
    %c0_i32 = arith.constant 0 : i32
    %c0_i32_0 = arith.constant 0 : i32
    return %arg0, %c0_i32 : i32, i32
  }
}

module attributes {stable_mosaic.version = 11 : i64} {
  func.func @_gemm_sigmoid_kernel(%arg0: i32, %arg1: memref<16x1024xbf16, #tpu.memory_space<vmem>>, %arg2: memref<1024x128xbf16, #tpu.memory_space<vmem>>, %arg3: memref<16x128xf32, #tpu.memory_space<vmem>>) attributes {dimension_semantics = [#tpu.dimension_semantics<parallel>], iteration_bounds = array<i64: 1>, scalar_prefetch = 0 : i64, scratch_operands = 0 : i64, tpu.core_type = #tpu.core_type<tc>, window_params = [{transform_indices = @transform_0, window_bounds = array<i64: 16, 1024>}, {pipeline_mode = #tpu.pipeline_mode<synchronous>, transform_indices = @transform_1, window_bounds = array<i64: 1024, 128>}, {transform_indices = @transform_2, window_bounds = array<i64: 16, 128>}]} {
    %c0 = arith.constant 0 : index
    %c0_0 = arith.constant 0 : index
    %0 = vector.load %arg1[%c0, %c0_0] : memref<16x1024xbf16, #tpu.memory_space<vmem>>, vector<16x1024xbf16>
    %c0_1 = arith.constant 0 : index
    %c0_2 = arith.constant 0 : index
    %1 = vector.load %arg2[%c0_1, %c0_2] : memref<1024x128xbf16, #tpu.memory_space<vmem>>, vector<1024x128xbf16>
    %cst = arith.constant dense<0.000000e+00> : vector<16x128xf32>
    %2 = tpu.matmul %0, %1, %cst {dimension_numbers = #tpu.dot_dimension_numbers<[1], [0], [0], [1], [0, 0, 1, 1], [], []>} : vector<16x1024xbf16>, vector<1024x128xbf16>, vector<16x128xf32> -> vector<16x128xf32>
    %cst_3 = arith.constant 0.000000e+00 : f32
    %3 = vector.broadcast %cst_3 : f32 to vector<16x128xf32>
    %4 = arith.subf %3, %2 : vector<16x128xf32>
    %5 = math.exp %4 : vector<16x128xf32>
    %cst_4 = arith.constant 1.000000e+00 : f32
    %6 = vector.broadcast %cst_4 : f32 to vector<16x128xf32>
    %7 = arith.addf %6, %5 : vector<16x128xf32>
    %cst_5 = arith.constant 1.000000e+00 : f32
    %8 = vector.broadcast %cst_5 : f32 to vector<16x128xf32>
    %9 = arith.divf %8, %7 : vector<16x128xf32>
    %c0_6 = arith.constant 0 : index
    %c0_7 = arith.constant 0 : index
    %10 = vector.load %arg3[%c0_6, %c0_7] : memref<16x128xf32, #tpu.memory_space<vmem>>, vector<16x128xf32>
    tpu.vector_store %arg3[%c0_6, %c0_7], %9 {strides = array<i32>} : memref<16x128xf32, #tpu.memory_space<vmem>>, vector<16x128xf32>,
    return
  }
  func.func @transform_0(%arg0: i32) -> (i32, i32) {
    %c0_i32 = arith.constant 0 : i32
    %c0_i32_0 = arith.constant 0 : i32
    return %arg0, %c0_i32 : i32, i32
  }
  func.func @transform_1(%arg0: i32) -> (i32, i32) {
    %c0_i32 = arith.constant 0 : i32
    %c0_i32_0 = arith.constant 0 : i32
    %c0_i32_1 = arith.constant 0 : i32
    return %c0_i32, %c0_i32_0 : i32, i32
  }
  func.func @transform_2(%arg0: i32) -> (i32, i32) {
    %c0_i32 = arith.constant 0 : i32
    %c0_i32_0 = arith.constant 0 : i32
    return %arg0, %c0_i32 : i32, i32
  }
}

</mosaic_0001>

<bundles_post_ra>
// kernel: discriminator_forward.8
= control target key start
LH: loop header
LB: loop body
LE: loop exit
PB: predicated region body
PF: predicated region fallthrough
CT: control target
= control target key end

     0   :  { %s1150_s9 = smov 0   ;;  %s1239_s0 = inlined_call_operand.vmem [shape: bf16[2048,128], index: 0, kind: input, shape index: {}]   ;;  %s1240_s1 = inlined_call_operand.vmem [shape: bf16[128,128], index: 1, kind: input, shape index: {}]   ;;  %s1241_s2 = inlined_call_operand.vmem [shape: bf16[2048,128], index: 2, kind: output, shape index: {}]  }
   0x1 LB: > { %s813_s10 = sadd.s32 4294967295, %s1133_s9   ;;  %p817_p0 = scmp.ge.s32.totalorder %s1133_s9, 1  ;;  %s1133_s9 = sphi %s1150_s9, %s12_s9  }
   0x2   : > { %p113_p1 = scmp.lt.s32.totalorder %s1133_s9, 9 }
   0x4   : > { %p114_p2 = pnand %p817_p0, %p113_p1 }
   0x5   : > { %s818_s13 = sshll.u32 (!%p114_p2), %s813_s10, 5 }
   0x6   : > { %117 = sbr.rel (%p114_p2) target bundleno = 274 (0x112), region = 28  ;;  %p136_p3 = scmp.lt.s32.totalorder (!%p114_p2), %s818_s13, 255 }
   0xb   : > { %v1103_v0 = vld [vmem:[%s1240_s1 + $0x38] sm:$0xff]   ;;  %v1104_v1 = vld [vmem:[%s1240_s1 + $0x30] sm:$0xff]   ;;  %s1243_s13 = smov (!%p136_p3, %s818_s13), 255  ;;  %v1105_v2 = vld [vmem:[%s1240_s1 + $0x28] sm:$0xff]  }
   0xc   : > { %1031 = vmatprep.subr.bf16.mxu0 %v1103_v0  ;;  %1079 = vmatprep.subr.bf16.mxu1 %v1103_v0  ;;  %s819_s18 = sshll.u32 %s1243_s13, 2  ;;  %v1106_v3 = vld [vmem:[%s1240_s1 + $0x20] sm:$0xff]   ;;  %v1107_v6 = vld [vmem:[%s1240_s1 + $0x18] sm:$0xff]   ;;  %v1108_v7 = vld [vmem:[%s1240_s1 + $0x10] sm:$0xff]  }
   0xd   : > { %1032 = vmatpush3.bf16.msra.mxu0 %v1103_v0  ;;  %1087 = vmatpush3.bf16.msra.mxu1 %v1103_v0  ;;  %s1175_s21 = scalar_lea.vmem %s1239_s0, %s819_s18  ;;  %v1109_v8 = vld [vmem:[%s1240_s1 + $0x8] sm:$0xff]   ;;  %v1110_v9 = vld [vmem:[%s1240_s1] sm:$0xff]   ;;  %s1213_s6 = scalar_lea.vmem %s1241_s2, %s819_s18 }
   0xe   : > { %1033 = vmatprep.subr.bf16.mxu0 %v1104_v1  ;;  %1080 = vmatprep.subr.bf16.mxu1 %v1104_v1  ;;  %v1111_v4 = vld [vmem:[%s1175_s21] sm:$0xff]   ;;  %v1113_v10 = vld [vmem:[%s1175_s21 + $0x8] sm:$0xff]   ;;  %v1115_v12 = vld [vmem:[%s1175_s21 + $0x10] sm:$0xff]  }
   0xf   : > { %v1112_v5 = vld [vmem:[%s1175_s21 + $0x40] sm:$0xff]   ;;  %1047 = vmatprep.mubr.bf16.mxu0 %v1111_v4  ;;  %v1114_v11 = vld [vmem:[%s1175_s21 + $0x48] sm:$0xff]   ;;  %v1116_v13 = vld [vmem:[%s1175_s21 + $0x50] sm:$0xff]  }
  0x10   : > { %1063 = vmatprep.mubr.bf16.mxu1 %v1112_v5  ;;  %v1117_v14 = vld [vmem:[%s1175_s21 + $0x18] sm:$0xff]   ;;  %v1119_v16 = vld [vmem:[%s1175_s21 + $0x20] sm:$0xff]   ;;  %v1121_v18 = vld [vmem:[%s1175_s21 + $0x28] sm:$0xff]  }
  0x11   : > { %1034 = vmatpush3.bf16.msra.mxu0 %v1104_v1  ;;  %1088 = vmatpush3.bf16.msra.mxu1 %v1104_v1  ;;  %v1118_v15 = vld [vmem:[%s1175_s21 + $0x58] sm:$0xff]   ;;  %v1120_v17 = vld [vmem:[%s1175_s21 + $0x60] sm:$0xff]   ;;  %v1122_v19 = vld [vmem:[%s1175_s21 + $0x68] sm:$0xff]  }
  0x12   : > { %1035 = vmatprep.subr.bf16.mxu0 %v1105_v2  ;;  %1081 = vmatprep.subr.bf16.mxu1 %v1105_v2  ;;  %v1123_v20 = vld [vmem:[%s1175_s21 + $0x30] sm:$0xff]   ;;  %v1125_v22 = vld [vmem:[%s1175_s21 + $0x38] sm:$0xff]  }
  0x13   : > { %v1124_v21 = vld [vmem:[%s1175_s21 + $0x70] sm:$0xff]   ;;  %v1126_v23 = vld [vmem:[%s1175_s21 + $0x78] sm:$0xff]  }
  0x15   : > { %1036 = vmatpush3.bf16.msra.mxu0 %v1105_v2  ;;  %1089 = vmatpush3.bf16.msra.mxu1 %v1105_v2 }
  0x16   : > { %1037 = vmatprep.subr.bf16.mxu0 %v1106_v3  ;;  %1082 = vmatprep.subr.bf16.mxu1 %v1106_v3 }
  0x19   : > { %1038 = vmatpush3.bf16.msra.mxu0 %v1106_v3  ;;  %1090 = vmatpush3.bf16.msra.mxu1 %v1106_v3 }
  0x1a   : > { %1039 = vmatprep.subr.bf16.mxu0 %v1107_v6  ;;  %1083 = vmatprep.subr.bf16.mxu1 %v1107_v6 }
  0x1d   : > { %1040 = vmatpush3.bf16.msra.mxu0 %v1107_v6  ;;  %1091 = vmatpush3.bf16.msra.mxu1 %v1107_v6 }
  0x1e   : > { %1041 = vmatprep.subr.bf16.mxu0 %v1108_v7  ;;  %1084 = vmatprep.subr.bf16.mxu1 %v1108_v7 }
  0x21   : > { %1042 = vmatpush3.bf16.msra.mxu0 %v1108_v7  ;;  %1092 = vmatpush3.bf16.msra.mxu1 %v1108_v7 }
  0x22   : > { %1043 = vmatprep.subr.bf16.mxu0 %v1109_v8  ;;  %1085 = vmatprep.subr.bf16.mxu1 %v1109_v8 }
  0x25   : > { %1044 = vmatpush3.bf16.msra.mxu0 %v1109_v8  ;;  %1093 = vmatpush3.bf16.msra.mxu1 %v1109_v8 }
  0x26   : > { %1045 = vmatprep.subr.bf16.mxu0 %v1110_v9  ;;  %1086 = vmatprep.subr.bf16.mxu1 %v1110_v9 }
  0x29   : > { %1046 = vmatpush3.bf16.msra.mxu0 %v1110_v9  ;;  %1094 = vmatpush3.bf16.msra.mxu1 %v1110_v9 }
  0x2c   : > { %1048 = vmatmul.mubr.bf16.vlgmr.msra.gmra.mxu0 %v1113_v10  ;;  %1064 = vmatmul.mubr.bf16.vlgmr.msra.gmra.mxu1 %v1114_v11 }
  0x2d   : > { %1051 = vmatprep.mubr.bf16.mxu0 %v1115_v12  ;;  %1067 = vmatprep.mubr.bf16.mxu1 %v1116_v13 }
  0x34   : > { %1052 = vmatmul.mubr.bf16.gmra.mxu0 %v1117_v14  ;;  %1068 = vmatmul.mubr.bf16.gmra.mxu1 %v1118_v15 }
  0x35   : > { %1055 = vmatprep.mubr.bf16.mxu0 %v1119_v16  ;;  %1071 = vmatprep.mubr.bf16.mxu1 %v1120_v17 }
  0x3c   : > { %1056 = vmatmul.mubr.bf16.gmra.mxu0 %v1121_v18  ;;  %1072 = vmatmul.mubr.bf16.gmra.mxu1 %v1122_v19 }
  0x3d   : > { %1059 = vmatprep.mubr.bf16.mxu0 %v1123_v20  ;;  %1075 = vmatprep.mubr.bf16.mxu1 %v1124_v21 }
  0x44   : > { %1060 = vmatmul.mubr.bf16.gmra.mxu0 %v1125_v22  ;;  %1076 = vmatmul.mubr.bf16.gmra.mxu1 %v1126_v23 }
  0xec   : > { %v1049_v24 = vpop.f32.mrf.mxu0  ;;  %v1065_v25 = vpop.f32.mrf.mxu1 }
  0xed   : > { %vm503_vm0 = vcmp.ge.f32.partialorder %v1049_v24, 0.0  ;;  %v535_v26 = vmul.f32 0.2, %v1049_v24  ;;  %v551_v27 = vmul.f32 0.2, %v1065_v25  ;;  %vm519_vm1 = vcmp.ge.f32.partialorder %v1065_v25, 0.0 }
  0xee   : > { %v374_v28 = vpop.f32.mrf.mxu0  ;;  %v438_v29 = vpop.f32.mrf.mxu1 }
  0xef   : > { %v567_v30 = vsel %vm503_vm0, %v1049_v24, %v535_v26  ;;  %v533_v31 = vmul.f32 0.2, %v374_v28  ;;  %vm501_vm2 = vcmp.ge.f32.partialorder %v374_v28, 0.0  ;;  %v583_v35 = vsel %vm519_vm1, %v1065_v25, %v551_v27 }
  0xf0   : > { %v1050_v32 = vpop.f32.mrf.mxu0  ;;  %v1066_v33 = vpop.f32.mrf.mxu1  ;;  %vm517_vm5 = vcmp.ge.f32.partialorder %v438_v29, 0.0  ;;  %v549_v36 = vmul.f32 0.2, %v438_v29 }
  0xf1   : > { %vm504_vm3 = vcmp.ge.f32.partialorder %v1050_v32, 0.0  ;;  %v536_v34 = vmul.f32 0.2, %v1050_v32  ;;  %vm520_vm4 = vcmp.ge.f32.partialorder %v1066_v33, 0.0  ;;  %v552_v37 = vmul.f32 0.2, %v1066_v33 }
  0xf2   : > { %v377_v38 = vpop.f32.mrf.mxu0  ;;  %v441_v39 = vpop.f32.mrf.mxu1  ;;  %v565_v42 = vsel %vm501_vm2, %v374_v28, %v533_v31  ;;  %v581_v51 = vsel %vm517_vm5, %v438_v29, %v549_v36 }
  0xf3   : > { %v568_v40 = vsel %vm504_vm3, %v1050_v32, %v536_v34  ;;  %vm502_vm6 = vcmp.ge.f32.partialorder %v377_v38, 0.0  ;;  %v534_v41 = vmul.f32 0.2, %v377_v38  ;;  %vm518_vm7 = vcmp.ge.f32.partialorder %v441_v39, 0.0 }
  0xf4   : > { %v920_v43 = vpack.c.bf16 %v568_v40, %v567_v30  ;;  %v584_v44 = vsel %vm520_vm4, %v1066_v33, %v552_v37  ;;  %v550_v45 = vmul.f32 0.2, %v441_v39  ;;  %v1053_v46 = vpop.f32.mrf.mxu0  ;;  %v1069_v47 = vpop.f32.mrf.mxu1 }
  0xf5   : > { %v960_v48 = vpack.c.bf16 %v584_v44, %v583_v35  ;;  %v566_v49 = vsel %vm502_vm6, %v377_v38, %v534_v41  ;;  %vm507_vm8 = vcmp.ge.f32.partialorder %v1053_v46, 0.0  ;;  %v539_v50 = vmul.f32 0.2, %v1053_v46 }
  0xf6   : > { %992 = vst [vmem:[%s1213_s6 + $0x8] sm:$0xff] %v920_v43   ;;  %v915_v52 = vpack.c.bf16 %v566_v49, %v565_v42  ;;  %v582_v53 = vsel %vm518_vm7, %v441_v39, %v550_v45  ;;  %v555_v54 = vmul.f32 0.2, %v1069_v47  ;;  %v390_v55 = vpop.f32.mrf.mxu0  ;;  %v454_v56 = vpop.f32.mrf.mxu1  ;;  %vm523_vm9 = vcmp.ge.f32.partialorder %v1069_v47, 0.0 }
  0xf7   : > { %1000 = vst [vmem:[%s1213_s6 + $0x48] sm:$0xff] %v960_v48   ;;  %v955_v57 = vpack.c.bf16 %v582_v53, %v581_v51  ;;  %v571_v58 = vsel %vm507_vm8, %v1053_v46, %v539_v50  ;;  %v537_v59 = vmul.f32 0.2, %v390_v55  ;;  %vm505_vm10 = vcmp.ge.f32.partialorder %v390_v55, 0.0 }
  0xf8   : > { %916 = vst [vmem:[%s1213_s6] sm:$0xff] %v915_v52   ;;  %v1054_v60 = vpop.f32.mrf.mxu0  ;;  %v1070_v61 = vpop.f32.mrf.mxu1  ;;  %v587_v63 = vsel %vm523_vm9, %v1069_v47, %v555_v54  ;;  %vm521_vm13 = vcmp.ge.f32.partialorder %v454_v56, 0.0  ;;  %v553_v0 = vmul.f32 0.2, %v454_v56 }
  0xf9   : > { %999 = vst [vmem:[%s1213_s6 + $0x40] sm:$0xff] %v955_v57   ;;  %vm508_vm11 = vcmp.ge.f32.partialorder %v1054_v60, 0.0  ;;  %v540_v62 = vmul.f32 0.2, %v1054_v60  ;;  %vm524_vm12 = vcmp.ge.f32.partialorder %v1070_v61, 0.0  ;;  %v569_v6 = vsel %vm505_vm10, %v390_v55, %v537_v59 }
  0xfa   : > { %v556_v1 = vmul.f32 0.2, %v1070_v61  ;;  %v393_v2 = vpop.f32.mrf.mxu0  ;;  %v457_v3 = vpop.f32.mrf.mxu1  ;;  %v585_v15 = vsel %vm521_vm13, %v454_v56, %v553_v0 }
  0xfb   : > { %v572_v4 = vsel %vm508_vm11, %v1054_v60, %v540_v62  ;;  %vm506_vm14 = vcmp.ge.f32.partialorder %v393_v2, 0.0  ;;  %v538_v5 = vmul.f32 0.2, %v393_v2  ;;  %vm522_vm15 = vcmp.ge.f32.partialorder %v457_v3, 0.0 }
  0xfc   : > { %v930_v7 = vpack.c.bf16 %v572_v4, %v571_v58  ;;  %v588_v8 = vsel %vm524_vm12, %v1070_v61, %v556_v1  ;;  %v554_v9 = vmul.f32 0.2, %v457_v3  ;;  %v1057_v10 = vpop.f32.mrf.mxu0  ;;  %v1073_v11 = vpop.f32.mrf.mxu1 }
  0xfd   : > { %v970_v12 = vpack.c.bf16 %v588_v8, %v587_v63  ;;  %v570_v13 = vsel %vm506_vm14, %v393_v2, %v538_v5  ;;  %vm511_vm0 = vcmp.ge.f32.partialorder %v1057_v10, 0.0  ;;  %v543_v14 = vmul.f32 0.2, %v1057_v10 }
  0xfe   : > { %994 = vst [vmem:[%s1213_s6 + $0x18] sm:$0xff] %v930_v7   ;;  %v925_v16 = vpack.c.bf16 %v570_v13, %v569_v6  ;;  %v586_v17 = vsel %vm522_vm15, %v457_v3, %v554_v9  ;;  %v559_v18 = vmul.f32 0.2, %v1073_v11  ;;  %v406_v19 = vpop.f32.mrf.mxu0  ;;  %v470_v20 = vpop.f32.mrf.mxu1  ;;  %vm527_vm1 = vcmp.ge.f32.partialorder %v1073_v11, 0.0 }
  0xff   : > { %1002 = vst [vmem:[%s1213_s6 + $0x58] sm:$0xff] %v970_v12   ;;  %v965_v21 = vpack.c.bf16 %v586_v17, %v585_v15  ;;  %v575_v22 = vsel %vm511_vm0, %v1057_v10, %v543_v14  ;;  %v541_v23 = vmul.f32 0.2, %v406_v19  ;;  %vm509_vm2 = vcmp.ge.f32.partialorder %v406_v19, 0.0 }
 0x100   : > { %993 = vst [vmem:[%s1213_s6 + $0x10] sm:$0xff] %v925_v16   ;;  %v1058_v24 = vpop.f32.mrf.mxu0  ;;  %v1074_v25 = vpop.f32.mrf.mxu1  ;;  %v591_v27 = vsel %vm527_vm1, %v1073_v11, %v559_v18  ;;  %vm525_vm5 = vcmp.ge.f32.partialorder %v470_v20, 0.0  ;;  %v557_v28 = vmul.f32 0.2, %v470_v20 }
 0x101   : > { %1001 = vst [vmem:[%s1213_s6 + $0x50] sm:$0xff] %v965_v21   ;;  %vm512_vm3 = vcmp.ge.f32.partialorder %v1058_v24, 0.0  ;;  %v544_v26 = vmul.f32 0.2, %v1058_v24  ;;  %vm528_vm4 = vcmp.ge.f32.partialorder %v1074_v25, 0.0  ;;  %v573_v34 = vsel %vm509_vm2, %v406_v19, %v541_v23 }
 0x102   : > { %v560_v29 = vmul.f32 0.2, %v1074_v25  ;;  %v409_v30 = vpop.f32.mrf.mxu0  ;;  %v473_v31 = vpop.f32.mrf.mxu1  ;;  %v589_v43 = vsel %vm525_vm5, %v470_v20, %v557_v28 }
 0x103   : > { %v576_v32 = vsel %vm512_vm3, %v1058_v24, %v544_v26  ;;  %vm510_vm6 = vcmp.ge.f32.partialorder %v409_v30, 0.0  ;;  %v542_v33 = vmul.f32 0.2, %v409_v30  ;;  %vm526_vm7 = vcmp.ge.f32.partialorder %v473_v31, 0.0 }
 0x104   : > { %v940_v35 = vpack.c.bf16 %v576_v32, %v575_v22  ;;  %v592_v36 = vsel %vm528_vm4, %v1074_v25, %v560_v29  ;;  %v558_v37 = vmul.f32 0.2, %v473_v31  ;;  %v1061_v38 = vpop.f32.mrf.mxu0  ;;  %v1077_v39 = vpop.f32.mrf.mxu1 }
 0x105   : > { %v980_v40 = vpack.c.bf16 %v592_v36, %v591_v27  ;;  %v574_v41 = vsel %vm510_vm6, %v409_v30, %v542_v33  ;;  %vm515_vm8 = vcmp.ge.f32.partialorder %v1061_v38, 0.0  ;;  %v547_v42 = vmul.f32 0.2, %v1061_v38 }
 0x106   : > { %996 = vst [vmem:[%s1213_s6 + $0x28] sm:$0xff] %v940_v35   ;;  %v935_v44 = vpack.c.bf16 %v574_v41, %v573_v34  ;;  %v590_v45 = vsel %vm526_vm7, %v473_v31, %v558_v37  ;;  %v422_v46 = vpop.f32.mrf.mxu0  ;;  %v486_v47 = vpop.f32.mrf.mxu1  ;;  %vm531_vm9 = vcmp.ge.f32.partialorder %v1077_v39, 0.0  ;;  %v563_v50 = vmul.f32 0.2, %v1077_v39 }
 0x107   : > { %1004 = vst [vmem:[%s1213_s6 + $0x68] sm:$0xff] %v980_v40   ;;  %v975_v48 = vpack.c.bf16 %v590_v45, %v589_v43  ;;  %v579_v49 = vsel %vm515_vm8, %v1061_v38, %v547_v42  ;;  %v545_v53 = vmul.f32 0.2, %v422_v46  ;;  %vm513_vm12 = vcmp.ge.f32.partialorder %v422_v46, 0.0 }
 0x108   : > { %995 = vst [vmem:[%s1213_s6 + $0x20] sm:$0xff] %v935_v44   ;;  %v1062_v51 = vpop.f32.mrf.mxu0  ;;  %v1078_v52 = vpop.f32.mrf.mxu1  ;;  %vm529_vm13 = vcmp.ge.f32.partialorder %v486_v47, 0.0  ;;  %v561_v55 = vmul.f32 0.2, %v486_v47  ;;  %v595_v61 = vsel %vm531_vm9, %v1077_v39, %v563_v50 }
 0x109   : > { %1003 = vst [vmem:[%s1213_s6 + $0x60] sm:$0xff] %v975_v48   ;;  %vm516_vm10 = vcmp.ge.f32.partialorder %v1062_v51, 0.0  ;;  %v548_v54 = vmul.f32 0.2, %v1062_v51  ;;  %vm532_vm11 = vcmp.ge.f32.partialorder %v1078_v52, 0.0  ;;  %v577_v1 = vsel %vm513_vm12, %v422_v46, %v545_v53 }
 0x10a   : > { %v564_v56 = vmul.f32 0.2, %v1078_v52  ;;  %v425_v57 = vpop.f32.mrf.mxu0  ;;  %v489_v58 = vpop.f32.mrf.mxu1  ;;  %v593_v4 = vsel %vm529_vm13, %v486_v47, %v561_v55 }
 0x10b   : > { %v580_v59 = vsel %vm516_vm10, %v1062_v51, %v548_v54  ;;  %vm514_vm14 = vcmp.ge.f32.partialorder %v425_v57, 0.0  ;;  %v546_v60 = vmul.f32 0.2, %v425_v57  ;;  %vm530_vm15 = vcmp.ge.f32.partialorder %v489_v58, 0.0 }
 0x10c   : > { %v950_v62 = vpack.c.bf16 %v580_v59, %v579_v49  ;;  %v596_v63 = vsel %vm532_vm11, %v1078_v52, %v564_v56  ;;  %v562_v0 = vmul.f32 0.2, %v489_v58 }
 0x10d   : > { %v990_v2 = vpack.c.bf16 %v596_v63, %v595_v61  ;;  %v578_v3 = vsel %vm514_vm14, %v425_v57, %v546_v60 }
 0x10e   : > { %998 = vst [vmem:[%s1213_s6 + $0x38] sm:$0xff] %v950_v62   ;;  %v945_v5 = vpack.c.bf16 %v578_v3, %v577_v1  ;;  %v594_v6 = vsel %vm530_vm15, %v489_v58, %v562_v0 }
 0x10f   : > { %1006 = vst [vmem:[%s1213_s6 + $0x78] sm:$0xff] %v990_v2   ;;  %v985_v7 = vpack.c.bf16 %v594_v6, %v593_v4 }
 0x110   : > { %997 = vst [vmem:[%s1213_s6 + $0x30] sm:$0xff] %v945_v5  }
 0x111   : > { %1005 = vst [vmem:[%s1213_s6 + $0x70] sm:$0xff] %v985_v7  }
 0x112 PF: > { %s12_s9 = sadd.s32 1, %s1133_s9  }
 0x113   : > { %p9_p4 = scmp.ge.s32.totalorder %s12_s9, 10  }
 0x115   :  { %11 = sbr.rel (!%p9_p4) target bundleno = 1 (0x1), region = 58 }

// kernel: discriminator_forward.10
= control target key start
LH: loop header
LB: loop body
LE: loop exit
PB: predicated region body
PF: predicated region fallthrough
CT: control target
= control target key end

     0   :  { %s804_s12 = smov 0   ;;  %s952_s0 = inlined_call_operand.vmem [shape: f32[512,128], index: 0, kind: input, shape index: {}]   ;;  %s953_s1 = inlined_call_operand.vmem [shape: f32[1,128], index: 1, kind: input, shape index: {}]   ;;  %s954_s2 = inlined_call_operand.vmem [shape: f32[1,128], index: 2, kind: input, shape index: {}]   ;;  %s955_s3 = inlined_call_operand.vmem [shape: bf16[512,128], index: 3, kind: output, shape index: {}]  }
   0x1 LB: > { %s596_s13 = sadd.s32 4294967295, %s782_s12   ;;  %p600_p0 = scmp.ge.s32.totalorder %s782_s12, 1  ;;  %s782_s12 = sphi %s804_s12, %s13_s12  }
   0x2   : > { %p138_p1 = scmp.lt.s32.totalorder %s782_s12, 3 }
   0x4   : > { %p139_p2 = pnand %p600_p0, %p138_p1 }
   0x5   : > { %s601_s14 = sshll.u32 (!%p139_p2), %s596_s13, 5 }
   0x6   : > { %142 = sbr.rel (%p139_p2) target bundleno = 65 (0x41), region = 32  ;;  %p163_p3 = scmp.lt.s32.totalorder (!%p139_p2), %s601_s14, 63 }
   0xb   : > { %s957_s14 = smov (!%p163_p3, %s601_s14), 63  ;;  %v818_v0 = vld [vmem:[%s953_s1] ss:$0 sm:$0xff] }
   0xc   : > { %s602_s15 = sshll.u32 %s957_s14, 3  ;;  %v828_v1 = vld [vmem:[%s954_s2] ss:$0 sm:$0xff]  ;;  %s604_s23 = sshll.u32 %s957_s14, 2 }
   0xd   : > { %s823_s20 = scalar_lea.vmem %s952_s0, %s602_s15  ;;  %s856_s26 = scalar_lea.vmem %s955_s3, %s604_s23 }
   0xe   : > { %v174_v2 = vld [vmem:[%s823_s20] sm:$0xff]  ;;  %v175_v3 = vld [vmem:[%s823_s20 + $0x8] sm:$0xff]  ;;  %v176_v4 = vld [vmem:[%s823_s20 + $0x10] sm:$0xff] }
   0xf   : > { %v213_v5 = vmul.f32 %v818_v0, %v174_v2  ;;  %v214_v6 = vmul.f32 %v818_v0, %v175_v3  ;;  %v177_v7 = vld [vmem:[%s823_s20 + $0x18] sm:$0xff]  ;;  %v215_v8 = vmul.f32 %v818_v0, %v176_v4  ;;  %v178_v9 = vld [vmem:[%s823_s20 + $0x20] sm:$0xff]  ;;  %v179_v10 = vld [vmem:[%s823_s20 + $0x28] sm:$0xff] }
  0x10   : > { %v216_v11 = vmul.f32 %v818_v0, %v177_v7  ;;  %v217_v12 = vmul.f32 %v818_v0, %v178_v9  ;;  %v218_v13 = vmul.f32 %v818_v0, %v179_v10  ;;  %v180_v14 = vld [vmem:[%s823_s20 + $0x30] sm:$0xff]  ;;  %v181_v15 = vld [vmem:[%s823_s20 + $0x38] sm:$0xff]  ;;  %v182_v30 = vld [vmem:[%s823_s20 + $0x40] sm:$0xff] }
  0x11   : > { %v252_v16 = vadd.f32 %v828_v1, %v213_v5  ;;  %v253_v17 = vadd.f32 %v828_v1, %v214_v6  ;;  %v254_v18 = vadd.f32 %v828_v1, %v215_v8  ;;  %v219_v19 = vmul.f32 %v818_v0, %v180_v14  ;;  %v183_v31 = vld [vmem:[%s823_s20 + $0x48] sm:$0xff]  ;;  %v184_v32 = vld [vmem:[%s823_s20 + $0x50] sm:$0xff]  ;;  %v185_v44 = vld [vmem:[%s823_s20 + $0x58] sm:$0xff] }
  0x12   : > { %v255_v20 = vadd.f32 %v828_v1, %v216_v11  ;;  %v256_v21 = vadd.f32 %v828_v1, %v217_v12  ;;  %v257_v22 = vadd.f32 %v828_v1, %v218_v13  ;;  %v220_v23 = vmul.f32 %v818_v0, %v181_v15  ;;  %v186_v46 = vld [vmem:[%s823_s20 + $0x60] sm:$0xff]  ;;  %v187_v56 = vld [vmem:[%s823_s20 + $0x68] sm:$0xff]  ;;  %v188_v60 = vld [vmem:[%s823_s20 + $0x70] sm:$0xff] }
  0x13   : > { %vm284_vm0 = vcmp.ge.f32.partialorder %v252_v16, 0.0  ;;  %vm285_vm1 = vcmp.ge.f32.partialorder %v253_v17, 0.0  ;;  %v316_v24 = vmul.f32 0.2, %v252_v16  ;;  %v317_v25 = vmul.f32 0.2, %v253_v17 }
  0x14   : > { %vm286_vm2 = vcmp.ge.f32.partialorder %v254_v18, 0.0  ;;  %vm287_vm3 = vcmp.ge.f32.partialorder %v255_v20, 0.0  ;;  %v318_v26 = vmul.f32 0.2, %v254_v18  ;;  %v319_v27 = vmul.f32 0.2, %v255_v20 }
  0x15   : > { %v348_v28 = vsel %vm284_vm0, %v252_v16, %v316_v24  ;;  %v349_v29 = vsel %vm285_vm1, %v253_v17, %v317_v25  ;;  %vm288_vm4 = vcmp.ge.f32.partialorder %v256_v21, 0.0  ;;  %vm289_vm5 = vcmp.ge.f32.partialorder %v257_v22, 0.0  ;;  %v189_v6 = vld [vmem:[%s823_s20 + $0x78] sm:$0xff]  ;;  %v190_v10 = vld [vmem:[%s823_s20 + $0x80] sm:$0xff] }
  0x16   : > { %v676_v33 = vpack.c.bf16 %v349_v29, %v348_v28  ;;  %v350_v34 = vsel %vm286_vm2, %v254_v18, %v318_v26  ;;  %v351_v35 = vsel %vm287_vm3, %v255_v20, %v319_v27  ;;  %v320_v36 = vmul.f32 0.2, %v256_v21  ;;  %v191_v18 = vld [vmem:[%s823_s20 + $0x88] sm:$0xff]  ;;  %v193_v26 = vld [vmem:[%s823_s20 + $0x98] sm:$0xff] }
  0x17   : > { %v681_v37 = vpack.c.bf16 %v351_v35, %v350_v34  ;;  %v321_v38 = vmul.f32 0.2, %v257_v22  ;;  %v258_v39 = vadd.f32 %v828_v1, %v219_v19  ;;  %v259_v40 = vadd.f32 %v828_v1, %v220_v23  ;;  %v192_v19 = vld [vmem:[%s823_s20 + $0x90] sm:$0xff] }
  0x18   : > { %677 = vst [vmem:[%s856_s26] sm:$0xff] %v676_v33   ;;  %v352_v41 = vsel %vm288_vm4, %v256_v21, %v320_v36  ;;  %v221_v42 = vmul.f32 %v818_v0, %v182_v30  ;;  %v222_v43 = vmul.f32 %v818_v0, %v183_v31  ;;  %v223_v45 = vmul.f32 %v818_v0, %v184_v32  ;;  %v194_v31 = vld [vmem:[%s823_s20 + $0xa0] sm:$0xff]  ;;  %v195_v32 = vld [vmem:[%s823_s20 + $0xa8] sm:$0xff] }
  0x19   : > { %753 = vst [vmem:[%s856_s26 + $0x8] sm:$0xff] %v681_v37   ;;  %v353_v47 = vsel %vm289_vm5, %v257_v22, %v321_v38  ;;  %vm290_vm6 = vcmp.ge.f32.partialorder %v258_v39, 0.0  ;;  %vm291_vm7 = vcmp.ge.f32.partialorder %v259_v40, 0.0  ;;  %v322_v48 = vmul.f32 0.2, %v258_v39 }
  0x1a   : > { %v686_v49 = vpack.c.bf16 %v353_v47, %v352_v41  ;;  %v323_v50 = vmul.f32 0.2, %v259_v40  ;;  %v260_v51 = vadd.f32 %v828_v1, %v221_v42  ;;  %v261_v52 = vadd.f32 %v828_v1, %v222_v43  ;;  %v196_v43 = vld [vmem:[%s823_s20 + $0xb0] sm:$0xff] }
  0x1b   : > { %v354_v53 = vsel %vm290_vm6, %v258_v39, %v322_v48  ;;  %v224_v54 = vmul.f32 %v818_v0, %v185_v44  ;;  %v262_v55 = vadd.f32 %v828_v1, %v223_v45  ;;  %v225_v57 = vmul.f32 %v818_v0, %v186_v46  ;;  %v197_v44 = vld [vmem:[%s823_s20 + $0xb8] sm:$0xff] }
  0x1c   : > { %754 = vst [vmem:[%s856_s26 + $0x10] sm:$0xff] %v686_v49   ;;  %v355_v58 = vsel %vm291_vm7, %v259_v40, %v323_v50  ;;  %vm292_vm8 = vcmp.ge.f32.partialorder %v260_v51, 0.0  ;;  %vm293_vm9 = vcmp.ge.f32.partialorder %v261_v52, 0.0  ;;  %v324_v59 = vmul.f32 0.2, %v260_v51 }
  0x1d   : > { %v691_v61 = vpack.c.bf16 %v355_v58, %v354_v53  ;;  %v325_v62 = vmul.f32 0.2, %v261_v52  ;;  %v263_v63 = vadd.f32 %v828_v1, %v224_v54  ;;  %vm294_vm10 = vcmp.ge.f32.partialorder %v262_v55, 0.0 }
  0x1e   : > { %v356_v2 = vsel %vm292_vm8, %v260_v51, %v324_v59  ;;  %v326_v3 = vmul.f32 0.2, %v262_v55  ;;  %v226_v4 = vmul.f32 %v818_v0, %v187_v56  ;;  %v264_v5 = vadd.f32 %v828_v1, %v225_v57  ;;  %v199_v59 = vld [vmem:[%s823_s20 + $0xc8] sm:$0xff] }
  0x1f   : > { %755 = vst [vmem:[%s856_s26 + $0x18] sm:$0xff] %v691_v61   ;;  %v357_v7 = vsel %vm293_vm9, %v261_v52, %v325_v62  ;;  %vm295_vm11 = vcmp.ge.f32.partialorder %v263_v63, 0.0  ;;  %v327_v8 = vmul.f32 0.2, %v263_v63  ;;  %v227_v9 = vmul.f32 %v818_v0, %v188_v60 }
  0x20   : > { %v696_v11 = vpack.c.bf16 %v357_v7, %v356_v2  ;;  %v358_v12 = vsel %vm294_vm10, %v262_v55, %v326_v3  ;;  %v265_v13 = vadd.f32 %v828_v1, %v226_v4  ;;  %vm296_vm12 = vcmp.ge.f32.partialorder %v264_v5, 0.0  ;;  %v198_v55 = vld [vmem:[%s823_s20 + $0xc0] sm:$0xff]  ;;  %v200_v4 = vld [vmem:[%s823_s20 + $0xd0] sm:$0xff] }
  0x21   : > { %v359_v14 = vsel %vm295_vm11, %v263_v63, %v327_v8  ;;  %v328_v15 = vmul.f32 0.2, %v264_v5  ;;  %v228_v16 = vmul.f32 %v818_v0, %v189_v6  ;;  %v266_v17 = vadd.f32 %v828_v1, %v227_v9  ;;  %v201_v9 = vld [vmem:[%s823_s20 + $0xd8] sm:$0xff] }
  0x22   : > { %756 = vst [vmem:[%s856_s26 + $0x20] sm:$0xff] %v696_v11   ;;  %v701_v20 = vpack.c.bf16 %v359_v14, %v358_v12  ;;  %vm297_vm13 = vcmp.ge.f32.partialorder %v265_v13, 0.0  ;;  %v329_v21 = vmul.f32 0.2, %v265_v13  ;;  %v229_v22 = vmul.f32 %v818_v0, %v190_v10  ;;  %v202_v10 = vld [vmem:[%s823_s20 + $0xe0] sm:$0xff]  ;;  %v203_v11 = vld [vmem:[%s823_s20 + $0xe8] sm:$0xff] }
  0x23   : > { %v360_v23 = vsel %vm296_vm12, %v264_v5, %v328_v15  ;;  %v267_v24 = vadd.f32 %v828_v1, %v228_v16  ;;  %vm298_vm14 = vcmp.ge.f32.partialorder %v266_v17, 0.0  ;;  %v330_v25 = vmul.f32 0.2, %v266_v17 }
  0x24   : > { %757 = vst [vmem:[%s856_s26 + $0x28] sm:$0xff] %v701_v20   ;;  %v361_v27 = vsel %vm297_vm13, %v265_v13, %v329_v21  ;;  %v230_v28 = vmul.f32 %v818_v0, %v191_v18  ;;  %v268_v29 = vadd.f32 %v828_v1, %v229_v22  ;;  %v231_v30 = vmul.f32 %v818_v0, %v192_v19  ;;  %v204_v22 = vld [vmem:[%s823_s20 + $0xf0] sm:$0xff] }
  0x25   : > { %v706_v33 = vpack.c.bf16 %v361_v27, %v360_v23  ;;  %vm299_vm15 = vcmp.ge.f32.partialorder %v267_v24, 0.0  ;;  %v331_v34 = vmul.f32 0.2, %v267_v24  ;;  %v362_v35 = vsel %vm298_vm14, %v266_v17, %v330_v25 }
  0x26   : > { %v269_v36 = vadd.f32 %v828_v1, %v230_v28  ;;  %vm300_vm0 = vcmp.ge.f32.partialorder %v268_v29, 0.0  ;;  %v332_v37 = vmul.f32 0.2, %v268_v29  ;;  %v232_v38 = vmul.f32 %v818_v0, %v193_v26 }
  0x27   : > { %758 = vst [vmem:[%s856_s26 + $0x30] sm:$0xff] %v706_v33   ;;  %v363_v39 = vsel %vm299_vm15, %v267_v24, %v331_v34  ;;  %v270_v40 = vadd.f32 %v828_v1, %v231_v30  ;;  %v233_v41 = vmul.f32 %v818_v0, %v194_v31  ;;  %v234_v42 = vmul.f32 %v818_v0, %v195_v32  ;;  %v205_v32 = vld [vmem:[%s823_s20 + $0xf8] sm:$0xff] }
  0x28   : > { %v711_v45 = vpack.c.bf16 %v363_v39, %v362_v35  ;;  %vm301_vm1 = vcmp.ge.f32.partialorder %v269_v36, 0.0  ;;  %v333_v46 = vmul.f32 0.2, %v269_v36  ;;  %v364_v47 = vsel %vm300_vm0, %v268_v29, %v332_v37 }
  0x29   : > { %v271_v48 = vadd.f32 %v828_v1, %v232_v38  ;;  %vm302_vm2 = vcmp.ge.f32.partialorder %v270_v40, 0.0  ;;  %v334_v49 = vmul.f32 0.2, %v270_v40  ;;  %v272_v50 = vadd.f32 %v828_v1, %v233_v41 }
  0x2a   : > { %759 = vst [vmem:[%s856_s26 + $0x38] sm:$0xff] %v711_v45   ;;  %v365_v51 = vsel %vm301_vm1, %v269_v36, %v333_v46  ;;  %v273_v52 = vadd.f32 %v828_v1, %v234_v42  ;;  %v235_v53 = vmul.f32 %v818_v0, %v196_v43  ;;  %v236_v54 = vmul.f32 %v818_v0, %v197_v44 }
  0x2b   : > { %v716_v56 = vpack.c.bf16 %v365_v51, %v364_v47  ;;  %vm303_vm3 = vcmp.ge.f32.partialorder %v271_v48, 0.0  ;;  %v335_v57 = vmul.f32 0.2, %v271_v48  ;;  %v366_v58 = vsel %vm302_vm2, %v270_v40, %v334_v49 }
  0x2c   : > { %vm304_vm4 = vcmp.ge.f32.partialorder %v272_v50, 0.0  ;;  %vm305_vm5 = vcmp.ge.f32.partialorder %v273_v52, 0.0  ;;  %v336_v60 = vmul.f32 0.2, %v272_v50  ;;  %v337_v61 = vmul.f32 0.2, %v273_v52 }
  0x2d   : > { %760 = vst [vmem:[%s856_s26 + $0x40] sm:$0xff] %v716_v56   ;;  %v367_v62 = vsel %vm303_vm3, %v271_v48, %v335_v57  ;;  %v274_v63 = vadd.f32 %v828_v1, %v235_v53  ;;  %v275_v2 = vadd.f32 %v828_v1, %v236_v54  ;;  %v237_v3 = vmul.f32 %v818_v0, %v198_v55 }
  0x2e   : > { %v721_v5 = vpack.c.bf16 %v367_v62, %v366_v58  ;;  %v368_v6 = vsel %vm304_vm4, %v272_v50, %v336_v60  ;;  %v369_v7 = vsel %vm305_vm5, %v273_v52, %v337_v61  ;;  %v238_v8 = vmul.f32 %v818_v0, %v199_v59 }
  0x2f   : > { %v726_v12 = vpack.c.bf16 %v369_v7, %v368_v6  ;;  %vm306_vm6 = vcmp.ge.f32.partialorder %v274_v63, 0.0  ;;  %vm307_vm7 = vcmp.ge.f32.partialorder %v275_v2, 0.0  ;;  %v338_v13 = vmul.f32 0.2, %v274_v63 }
  0x30   : > { %761 = vst [vmem:[%s856_s26 + $0x48] sm:$0xff] %v721_v5   ;;  %v339_v14 = vmul.f32 0.2, %v275_v2  ;;  %v276_v15 = vadd.f32 %v828_v1, %v237_v3  ;;  %v277_v16 = vadd.f32 %v828_v1, %v238_v8  ;;  %v239_v17 = vmul.f32 %v818_v0, %v200_v4 }
  0x31   : > { %762 = vst [vmem:[%s856_s26 + $0x50] sm:$0xff] %v726_v12   ;;  %v370_v18 = vsel %vm306_vm6, %v274_v63, %v338_v13  ;;  %v240_v19 = vmul.f32 %v818_v0, %v201_v9  ;;  %v241_v20 = vmul.f32 %v818_v0, %v202_v10  ;;  %v242_v21 = vmul.f32 %v818_v0, %v203_v11 }
  0x32   : > { %v371_v23 = vsel %vm307_vm7, %v275_v2, %v339_v14  ;;  %vm308_vm8 = vcmp.ge.f32.partialorder %v276_v15, 0.0  ;;  %vm309_vm9 = vcmp.ge.f32.partialorder %v277_v16, 0.0  ;;  %v340_v24 = vmul.f32 0.2, %v276_v15 }
  0x33   : > { %v731_v25 = vpack.c.bf16 %v371_v23, %v370_v18  ;;  %v341_v26 = vmul.f32 0.2, %v277_v16  ;;  %v278_v27 = vadd.f32 %v828_v1, %v239_v17  ;;  %v279_v28 = vadd.f32 %v828_v1, %v240_v19 }
  0x34   : > { %v372_v29 = vsel %vm308_vm8, %v276_v15, %v340_v24  ;;  %v280_v30 = vadd.f32 %v828_v1, %v241_v20  ;;  %v281_v31 = vadd.f32 %v828_v1, %v242_v21  ;;  %v243_v33 = vmul.f32 %v818_v0, %v204_v22 }
  0x35   : > { %763 = vst [vmem:[%s856_s26 + $0x58] sm:$0xff] %v731_v25   ;;  %v373_v34 = vsel %vm309_vm9, %v277_v16, %v341_v26  ;;  %vm310_vm10 = vcmp.ge.f32.partialorder %v278_v27, 0.0  ;;  %vm311_vm11 = vcmp.ge.f32.partialorder %v279_v28, 0.0  ;;  %v342_v35 = vmul.f32 0.2, %v278_v27 }
  0x36   : > { %v736_v36 = vpack.c.bf16 %v373_v34, %v372_v29  ;;  %v343_v37 = vmul.f32 0.2, %v279_v28  ;;  %vm312_vm12 = vcmp.ge.f32.partialorder %v280_v30, 0.0  ;;  %vm313_vm13 = vcmp.ge.f32.partialorder %v281_v31, 0.0 }
  0x37   : > { %v374_v38 = vsel %vm310_vm10, %v278_v27, %v342_v35  ;;  %v344_v39 = vmul.f32 0.2, %v280_v30  ;;  %v345_v40 = vmul.f32 0.2, %v281_v31  ;;  %v244_v41 = vmul.f32 %v818_v0, %v205_v32 }
  0x38   : > { %764 = vst [vmem:[%s856_s26 + $0x60] sm:$0xff] %v736_v36   ;;  %v375_v42 = vsel %vm311_vm11, %v279_v28, %v343_v37  ;;  %v282_v43 = vadd.f32 %v828_v1, %v243_v33 }
  0x39   : > { %v741_v44 = vpack.c.bf16 %v375_v42, %v374_v38  ;;  %v376_v45 = vsel %vm312_vm12, %v280_v30, %v344_v39  ;;  %v377_v46 = vsel %vm313_vm13, %v281_v31, %v345_v40  ;;  %v283_v47 = vadd.f32 %v828_v1, %v244_v41 }
  0x3a   : > { %v746_v48 = vpack.c.bf16 %v377_v46, %v376_v45  ;;  %vm314_vm14 = vcmp.ge.f32.partialorder %v282_v43, 0.0  ;;  %v346_v49 = vmul.f32 0.2, %v282_v43 }
  0x3b   : > { %765 = vst [vmem:[%s856_s26 + $0x68] sm:$0xff] %v741_v44   ;;  %vm315_vm15 = vcmp.ge.f32.partialorder %v283_v47, 0.0  ;;  %v347_v50 = vmul.f32 0.2, %v283_v47 }
  0x3c   : > { %766 = vst [vmem:[%s856_s26 + $0x70] sm:$0xff] %v746_v48   ;;  %v378_v51 = vsel %vm314_vm14, %v282_v43, %v346_v49 }
  0x3d   : > { %v379_v52 = vsel %vm315_vm15, %v283_v47, %v347_v50 }
  0x3e   : > { %v751_v0 = vpack.c.bf16 %v379_v52, %v378_v51 }
  0x40   : > { %767 = vst [vmem:[%s856_s26 + $0x78] sm:$0xff] %v751_v0  }
  0x41 PF: > { %s13_s12 = sadd.s32 1, %s782_s12  }
  0x42   : > { %p10_p4 = scmp.ge.s32.totalorder %s13_s12, 4  }
  0x44   :  { %12 = sbr.rel (!%p10_p4) target bundleno = 1 (0x1), region = 62 }

// kernel: discriminator_forward.9
= control target key start
LH: loop header
LB: loop body
LE: loop exit
PB: predicated region body
PF: predicated region fallthrough
CT: control target
= control target key end

     0   :  { %s1006_s15 = smov 0   ;;  %s1198_s0 = inlined_call_operand.vmem [shape: bf16[512,128], index: 0, kind: input, shape index: {}]   ;;  %s1199_s1 = inlined_call_operand.vmem [shape: bf16[128,128], index: 1, kind: input, shape index: {}]   ;;  %s1200_s2 = inlined_call_operand.vmem [shape: f32[512,128], index: 2, kind: output, shape index: {0}]   ;;  %s1201_s3 = inlined_call_operand.vmem [shape: f32[2,1,128], index: 3, kind: output, shape index: {1}]   ;;  %s1202_s4 = inlined_call_operand.vmem [shape: f32[2,1,128], index: 4, kind: output, shape index: {2}]  }
   0x1 LB: > { %s1012_s16 = sadd.s32 4294967295, %s979_s15   ;;  %p822_p0 = scmp.ge.s32.totalorder %s979_s15, 1  ;;  %s979_s15 = sphi %s1006_s15, %s15_s15  }
   0x2   : > { %p168_p1 = scmp.lt.s32.totalorder %s979_s15, 3 }
   0x4   : > { %p169_p2 = pnand %p822_p0, %p168_p1 }
   0x5   : > { %s823_s19 = sshll.u32 (!%p169_p2), %s1012_s16, 5  ;;  %p212_p4 = scmp.lt.s32.totalorder (!%p169_p2), %s1012_s16, 1 }
   0x6   : > { %172 = sbr.rel (%p169_p2) target bundleno = 320 (0x140), region = 28  ;;  %p201_p3 = scmp.lt.s32.totalorder (!%p169_p2), %s823_s19, 63 }
   0xb   : > { %v949_v0 = vld [vmem:[%s1199_s1 + $0x38] sm:$0xff]   ;;  %v950_v1 = vld [vmem:[%s1199_s1 + $0x30] sm:$0xff]   ;;  %s1204_s19 = smov (!%p201_p3, %s823_s19), 63  ;;  %v951_v2 = vld [vmem:[%s1199_s1 + $0x28] sm:$0xff]   ;;  %s1206_s16 = smov (!%p212_p4, %s1012_s16), 1 }
   0xc   : > { %877 = vmatprep.subr.bf16.mxu0 %v949_v0  ;;  %925 = vmatprep.subr.bf16.mxu1 %v949_v0  ;;  %s824_s24 = sshll.u32 %s1204_s19, 2  ;;  %v952_v3 = vld [vmem:[%s1199_s1 + $0x20] sm:$0xff]   ;;  %v953_v5 = vld [vmem:[%s1199_s1 + $0x18] sm:$0xff]   ;;  %v954_v6 = vld [vmem:[%s1199_s1 + $0x10] sm:$0xff]   ;;  %s826_s12 = sshll.u32 %s1204_s19, 3 }
   0xd   : > { %878 = vmatpush3.bf16.msra.mxu0 %v949_v0  ;;  %933 = vmatpush3.bf16.msra.mxu1 %v949_v0  ;;  %s1032_s27 = scalar_lea.vmem %s1198_s0, %s824_s24  ;;  %v955_v8 = vld [vmem:[%s1199_s1 + $0x8] sm:$0xff]   ;;  %v956_v9 = vld [vmem:[%s1199_s1] sm:$0xff]   ;;  %s1069_s17 = scalar_lea.vmem %s1200_s2, %s826_s12 }
   0xe   : > { %879 = vmatprep.subr.bf16.mxu0 %v950_v1  ;;  %926 = vmatprep.subr.bf16.mxu1 %v950_v1  ;;  %v957_v4 = vld [vmem:[%s1032_s27] sm:$0xff]   ;;  %v958_v10 = vld [vmem:[%s1032_s27 + $0x8] sm:$0xff]   ;;  %v959_v12 = vld [vmem:[%s1032_s27 + $0x10] sm:$0xff]   ;;  %s214_s20 = scalar_lea.vmem %s1201_s3, %s1206_s16  ;;  %s217_s23 = scalar_lea.vmem %s1202_s4, %s1206_s16 }
   0xf   : > { %893 = vmatprep.mubr.bf16.mxu0 %v957_v4  ;;  %v965_v7 = vld [vmem:[%s1032_s27 + $0x40] sm:$0xff]   ;;  %v966_v11 = vld [vmem:[%s1032_s27 + $0x48] sm:$0xff]   ;;  %v967_v13 = vld [vmem:[%s1032_s27 + $0x50] sm:$0xff]  }
  0x10   : > { %909 = vmatprep.mubr.bf16.mxu1 %v965_v7  ;;  %v960_v14 = vld [vmem:[%s1032_s27 + $0x18] sm:$0xff]   ;;  %v961_v16 = vld [vmem:[%s1032_s27 + $0x20] sm:$0xff]   ;;  %v962_v18 = vld [vmem:[%s1032_s27 + $0x28] sm:$0xff]  }
  0x11   : > { %880 = vmatpush3.bf16.msra.mxu0 %v950_v1  ;;  %934 = vmatpush3.bf16.msra.mxu1 %v950_v1  ;;  %v968_v15 = vld [vmem:[%s1032_s27 + $0x58] sm:$0xff]   ;;  %v969_v17 = vld [vmem:[%s1032_s27 + $0x60] sm:$0xff]   ;;  %v970_v19 = vld [vmem:[%s1032_s27 + $0x68] sm:$0xff]  }
  0x12   : > { %881 = vmatprep.subr.bf16.mxu0 %v951_v2  ;;  %927 = vmatprep.subr.bf16.mxu1 %v951_v2  ;;  %v963_v20 = vld [vmem:[%s1032_s27 + $0x30] sm:$0xff]   ;;  %v964_v22 = vld [vmem:[%s1032_s27 + $0x38] sm:$0xff]  }
  0x13   : > { %v971_v21 = vld [vmem:[%s1032_s27 + $0x70] sm:$0xff]   ;;  %v972_v23 = vld [vmem:[%s1032_s27 + $0x78] sm:$0xff]  }
  0x15   : > { %882 = vmatpush3.bf16.msra.mxu0 %v951_v2  ;;  %935 = vmatpush3.bf16.msra.mxu1 %v951_v2 }
  0x16   : > { %883 = vmatprep.subr.bf16.mxu0 %v952_v3  ;;  %928 = vmatprep.subr.bf16.mxu1 %v952_v3 }
  0x19   : > { %884 = vmatpush3.bf16.msra.mxu0 %v952_v3  ;;  %936 = vmatpush3.bf16.msra.mxu1 %v952_v3 }
  0x1a   : > { %885 = vmatprep.subr.bf16.mxu0 %v953_v5  ;;  %929 = vmatprep.subr.bf16.mxu1 %v953_v5 }
  0x1d   : > { %886 = vmatpush3.bf16.msra.mxu0 %v953_v5  ;;  %937 = vmatpush3.bf16.msra.mxu1 %v953_v5 }
  0x1e   : > { %887 = vmatprep.subr.bf16.mxu0 %v954_v6  ;;  %930 = vmatprep.subr.bf16.mxu1 %v954_v6 }
  0x21   : > { %888 = vmatpush3.bf16.msra.mxu0 %v954_v6  ;;  %938 = vmatpush3.bf16.msra.mxu1 %v954_v6 }
  0x22   : > { %889 = vmatprep.subr.bf16.mxu0 %v955_v8  ;;  %931 = vmatprep.subr.bf16.mxu1 %v955_v8 }
  0x25   : > { %890 = vmatpush3.bf16.msra.mxu0 %v955_v8  ;;  %939 = vmatpush3.bf16.msra.mxu1 %v955_v8 }
  0x26   : > { %891 = vmatprep.subr.bf16.mxu0 %v956_v9  ;;  %932 = vmatprep.subr.bf16.mxu1 %v956_v9 }
  0x29   : > { %892 = vmatpush3.bf16.msra.mxu0 %v956_v9  ;;  %940 = vmatpush3.bf16.msra.mxu1 %v956_v9 }
  0x2c   : > { %894 = vmatmul.mubr.bf16.vlgmr.msra.gmra.mxu0 %v958_v10  ;;  %910 = vmatmul.mubr.bf16.vlgmr.msra.gmra.mxu1 %v966_v11 }
  0x2d   : > { %897 = vmatprep.mubr.bf16.mxu0 %v959_v12  ;;  %913 = vmatprep.mubr.bf16.mxu1 %v967_v13 }
  0x34   : > { %898 = vmatmul.mubr.bf16.gmra.mxu0 %v960_v14  ;;  %914 = vmatmul.mubr.bf16.gmra.mxu1 %v968_v15 }
  0x35   : > { %901 = vmatprep.mubr.bf16.mxu0 %v961_v16  ;;  %917 = vmatprep.mubr.bf16.mxu1 %v969_v17 }
  0x3c   : > { %902 = vmatmul.mubr.bf16.gmra.mxu0 %v962_v18  ;;  %918 = vmatmul.mubr.bf16.gmra.mxu1 %v970_v19 }
  0x3d   : > { %905 = vmatprep.mubr.bf16.mxu0 %v963_v20  ;;  %921 = vmatprep.mubr.bf16.mxu1 %v971_v21 }
  0x44   : > { %906 = vmatmul.mubr.bf16.gmra.mxu0 %v964_v22  ;;  %922 = vmatmul.mubr.bf16.gmra.mxu1 %v972_v23 }
  0xec   : > { %v895_v24 = vpop.f32.mrf.mxu0  ;;  %v1071_v25 = vpop.f32.mrf.mxu1 }
  0xed   : > { %574 = vst [vmem:[%s1069_s17 + $0x10] sm:$0xff] %v895_v24  ;;  %590 = vst [vmem:[%s1069_s17 + $0x90] sm:$0xff] %v1071_v25  ;;  %v644_v37 = vmul.f32 %v895_v24, %v895_v24 }
  0xee   : > { %v445_v26 = vpop.f32.mrf.mxu0  ;;  %v1076_v27 = vpop.f32.mrf.mxu1 }
  0xef   : > { %572 = vst [vmem:[%s1069_s17] sm:$0xff] %v445_v26  ;;  %588 = vst [vmem:[%s1069_s17 + $0x80] sm:$0xff] %v1076_v27  ;;  %v642_v32 = vmul.f32 %v445_v26, %v445_v26 }
  0xf0   : > { %v896_v28 = vpop.f32.mrf.mxu0  ;;  %v1081_v29 = vpop.f32.mrf.mxu1 }
  0xf1   : > { %575 = vst [vmem:[%s1069_s17 + $0x18] sm:$0xff] %v896_v28  ;;  %591 = vst [vmem:[%s1069_s17 + $0x98] sm:$0xff] %v1081_v29  ;;  %v645_v42 = vmul.f32 %v896_v28, %v896_v28 }
  0xf2   : > { %v448_v30 = vpop.f32.mrf.mxu0  ;;  %v1086_v31 = vpop.f32.mrf.mxu1 }
  0xf3   : > { %573 = vst [vmem:[%s1069_s17 + $0x8] sm:$0xff] %v448_v30  ;;  %v604_v33 = vadd.f32 %v448_v30, %v445_v26  ;;  %v643_v34 = vmul.f32 %v448_v30, %v448_v30  ;;  %589 = vst [vmem:[%s1069_s17 + $0x88] sm:$0xff] %v1086_v31 }
  0xf4   : > { %v899_v35 = vpop.f32.mrf.mxu0  ;;  %v1091_v36 = vpop.f32.mrf.mxu1 }
  0xf5   : > { %v605_v38 = vadd.f32 %v895_v24, %v604_v33  ;;  %v674_v39 = vadd.f32 %v643_v34, %v642_v32  ;;  %578 = vst [vmem:[%s1069_s17 + $0x30] sm:$0xff] %v899_v35  ;;  %594 = vst [vmem:[%s1069_s17 + $0xb0] sm:$0xff] %v1091_v36  ;;  %v648_v57 = vmul.f32 %v899_v35, %v899_v35 }
  0xf6   : > { %v461_v40 = vpop.f32.mrf.mxu0  ;;  %v1096_v41 = vpop.f32.mrf.mxu1 }
  0xf7   : > { %v675_v43 = vadd.f32 %v674_v39, %v644_v37  ;;  %576 = vst [vmem:[%s1069_s17 + $0x20] sm:$0xff] %v461_v40  ;;  %v606_v44 = vadd.f32 %v896_v28, %v605_v38  ;;  %592 = vst [vmem:[%s1069_s17 + $0xa0] sm:$0xff] %v1096_v41  ;;  %v646_v48 = vmul.f32 %v461_v40, %v461_v40 }
  0xf8   : > { %v900_v45 = vpop.f32.mrf.mxu0  ;;  %v1101_v46 = vpop.f32.mrf.mxu1 }
  0xf9   : > { %v607_v47 = vadd.f32 %v606_v44, %v461_v40  ;;  %v676_v49 = vadd.f32 %v675_v43, %v645_v42  ;;  %579 = vst [vmem:[%s1069_s17 + $0x38] sm:$0xff] %v900_v45  ;;  %595 = vst [vmem:[%s1069_s17 + $0xb8] sm:$0xff] %v1101_v46  ;;  %v649_v62 = vmul.f32 %v900_v45, %v900_v45 }
  0xfa   : > { %v464_v50 = vpop.f32.mrf.mxu0  ;;  %v1106_v51 = vpop.f32.mrf.mxu1  ;;  %v658_v43 = vmul.f32 %v1076_v27, %v1076_v27 }
  0xfb   : > { %v677_v52 = vadd.f32 %v676_v49, %v646_v48  ;;  %577 = vst [vmem:[%s1069_s17 + $0x28] sm:$0xff] %v464_v50  ;;  %v608_v53 = vadd.f32 %v607_v47, %v464_v50  ;;  %v647_v54 = vmul.f32 %v464_v50, %v464_v50  ;;  %593 = vst [vmem:[%s1069_s17 + $0xa8] sm:$0xff] %v1106_v51 }
  0xfc   : > { %v903_v55 = vpop.f32.mrf.mxu0  ;;  %v1111_v56 = vpop.f32.mrf.mxu1  ;;  %v659_v48 = vmul.f32 %v1086_v31, %v1086_v31  ;;  %v660_v50 = vmul.f32 %v1071_v25, %v1071_v25 }
  0xfd   : > { %v609_v58 = vadd.f32 %v899_v35, %v608_v53  ;;  %v678_v59 = vadd.f32 %v677_v52, %v647_v54  ;;  %582 = vst [vmem:[%s1069_s17 + $0x50] sm:$0xff] %v903_v55  ;;  %598 = vst [vmem:[%s1069_s17 + $0xd0] sm:$0xff] %v1111_v56  ;;  %v652_v13 = vmul.f32 %v903_v55, %v903_v55 }
  0xfe   : > { %v477_v60 = vpop.f32.mrf.mxu0  ;;  %v1116_v61 = vpop.f32.mrf.mxu1  ;;  %v661_v54 = vmul.f32 %v1081_v29, %v1081_v29 }
  0xff   : > { %v679_v63 = vadd.f32 %v678_v59, %v648_v57  ;;  %580 = vst [vmem:[%s1069_s17 + $0x40] sm:$0xff] %v477_v60  ;;  %v610_v0 = vadd.f32 %v900_v45, %v609_v58  ;;  %596 = vst [vmem:[%s1069_s17 + $0xc0] sm:$0xff] %v1116_v61  ;;  %v650_v4 = vmul.f32 %v477_v60, %v477_v60 }
 0x100   : > { %v904_v1 = vpop.f32.mrf.mxu0  ;;  %v1121_v2 = vpop.f32.mrf.mxu1  ;;  %v662_v58 = vmul.f32 %v1096_v41, %v1096_v41 }
 0x101   : > { %v611_v3 = vadd.f32 %v610_v0, %v477_v60  ;;  %v680_v5 = vadd.f32 %v679_v63, %v649_v62  ;;  %583 = vst [vmem:[%s1069_s17 + $0x58] sm:$0xff] %v904_v1  ;;  %599 = vst [vmem:[%s1069_s17 + $0xd8] sm:$0xff] %v1121_v2  ;;  %v653_v18 = vmul.f32 %v904_v1, %v904_v1 }
 0x102   : > { %v480_v6 = vpop.f32.mrf.mxu0  ;;  %v1126_v7 = vpop.f32.mrf.mxu1  ;;  %v663_v62 = vmul.f32 %v1106_v51, %v1106_v51 }
 0x103   : > { %v681_v8 = vadd.f32 %v680_v5, %v650_v4  ;;  %581 = vst [vmem:[%s1069_s17 + $0x48] sm:$0xff] %v480_v6  ;;  %v612_v9 = vadd.f32 %v611_v3, %v480_v6  ;;  %v651_v10 = vmul.f32 %v480_v6, %v480_v6  ;;  %597 = vst [vmem:[%s1069_s17 + $0xc8] sm:$0xff] %v1126_v7 }
 0x104   : > { %v907_v11 = vpop.f32.mrf.mxu0  ;;  %v1131_v12 = vpop.f32.mrf.mxu1  ;;  %v666_v4 = vmul.f32 %v1116_v61, %v1116_v61 }
 0x105   : > { %v613_v14 = vadd.f32 %v903_v55, %v612_v9  ;;  %v682_v15 = vadd.f32 %v681_v8, %v651_v10  ;;  %586 = vst [vmem:[%s1069_s17 + $0x70] sm:$0xff] %v907_v11  ;;  %602 = vst [vmem:[%s1069_s17 + $0xf0] sm:$0xff] %v1131_v12  ;;  %v656_v35 = vmul.f32 %v907_v11, %v907_v11 }
 0x106   : > { %v493_v16 = vpop.f32.mrf.mxu0  ;;  %v557_v17 = vpop.f32.mrf.mxu1  ;;  %v667_v8 = vmul.f32 %v1126_v7, %v1126_v7 }
 0x107   : > { %v683_v19 = vadd.f32 %v682_v15, %v652_v13  ;;  %584 = vst [vmem:[%s1069_s17 + $0x60] sm:$0xff] %v493_v16  ;;  %v614_v20 = vadd.f32 %v904_v1, %v613_v14  ;;  %600 = vst [vmem:[%s1069_s17 + $0xe0] sm:$0xff] %v557_v17  ;;  %v654_v24 = vmul.f32 %v493_v16, %v493_v16 }
 0x108   : > { %v908_v21 = vpop.f32.mrf.mxu0  ;;  %v1138_v22 = vpop.f32.mrf.mxu1  ;;  %v670_v14 = vmul.f32 %v557_v17, %v557_v17 }
 0x109   : > { %v615_v23 = vadd.f32 %v614_v20, %v493_v16  ;;  %v684_v26 = vadd.f32 %v683_v19, %v653_v18  ;;  %587 = vst [vmem:[%s1069_s17 + $0x78] sm:$0xff] %v908_v21  ;;  %603 = vst [vmem:[%s1069_s17 + $0xf8] sm:$0xff] %v1138_v22  ;;  %v657_v39 = vmul.f32 %v908_v21, %v908_v21 }
 0x10a   : > { %v496_v28 = vpop.f32.mrf.mxu0  ;;  %v560_v30 = vpop.f32.mrf.mxu1  ;;  %v672_v19 = vmul.f32 %v1131_v12, %v1131_v12 }
 0x10b   : > { %v685_v32 = vadd.f32 %v684_v26, %v654_v24  ;;  %585 = vst [vmem:[%s1069_s17 + $0x68] sm:$0xff] %v496_v28  ;;  %v616_v33 = vadd.f32 %v615_v23, %v496_v28  ;;  %v655_v34 = vmul.f32 %v496_v28, %v496_v28  ;;  %601 = vst [vmem:[%s1069_s17 + $0xe8] sm:$0xff] %v560_v30 }
 0x10d   : > { %v617_v37 = vadd.f32 %v907_v11, %v616_v33  ;;  %v686_v38 = vadd.f32 %v685_v32, %v655_v34 }
 0x10f   : > { %v618_v40 = vadd.f32 %v908_v21, %v617_v37  ;;  %v687_v42 = vadd.f32 %v686_v38, %v656_v35  ;;  %v673_v21 = vmul.f32 %v1138_v22, %v1138_v22 }
 0x111   : > { %v688_v44 = vadd.f32 %v687_v42, %v657_v39  ;;  %v619_v45 = vadd.f32 %v618_v40, %v1076_v27 }
 0x113   : > { %v620_v47 = vadd.f32 %v619_v45, %v1086_v31  ;;  %v689_v49 = vadd.f32 %v688_v44, %v658_v43 }
 0x115   : > { %v621_v52 = vadd.f32 %v1071_v25, %v620_v47  ;;  %v690_v53 = vadd.f32 %v689_v49, %v659_v48  ;;  %v664_v25 = vmul.f32 %v1091_v36, %v1091_v36 }
 0x117   : > { %v691_v55 = vadd.f32 %v690_v53, %v660_v50  ;;  %v622_v57 = vadd.f32 %v1081_v29, %v621_v52  ;;  %v665_v29 = vmul.f32 %v1101_v46, %v1101_v46 }
 0x119   : > { %v623_v27 = vadd.f32 %v622_v57, %v1096_v41  ;;  %v692_v59 = vadd.f32 %v691_v55, %v661_v54 }
 0x11b   : > { %v693_v31 = vadd.f32 %v692_v59, %v662_v58  ;;  %v624_v60 = vadd.f32 %v623_v27, %v1106_v51 }
 0x11d   : > { %v625_v63 = vadd.f32 %v1091_v36, %v624_v60  ;;  %v694_v0 = vadd.f32 %v693_v31, %v663_v62  ;;  %v668_v36 = vmul.f32 %v1111_v56, %v1111_v56 }
 0x11f   : > { %v695_v1 = vadd.f32 %v694_v0, %v664_v25  ;;  %v626_v3 = vadd.f32 %v1101_v46, %v625_v63  ;;  %v669_v46 = vmul.f32 %v1121_v2, %v1121_v2 }
 0x121   : > { %v627_v41 = vadd.f32 %v626_v3, %v1116_v61  ;;  %v696_v5 = vadd.f32 %v695_v1, %v665_v29 }
 0x123   : > { %v697_v6 = vadd.f32 %v696_v5, %v666_v4  ;;  %v628_v51 = vadd.f32 %v627_v41, %v1126_v7  ;;  %v671_v7 = vmul.f32 %v560_v30, %v560_v30 }
 0x125   : > { %v629_v9 = vadd.f32 %v1111_v56, %v628_v51  ;;  %v698_v10 = vadd.f32 %v697_v6, %v667_v8 }
 0x127   : > { %v699_v11 = vadd.f32 %v698_v10, %v668_v36  ;;  %v630_v61 = vadd.f32 %v1121_v2, %v629_v9 }
 0x129   : > { %v631_v13 = vadd.f32 %v630_v61, %v557_v17  ;;  %v700_v15 = vadd.f32 %v699_v11, %v669_v46 }
 0x12b   : > { %v701_v16 = vadd.f32 %v700_v15, %v670_v14  ;;  %v632_v18 = vadd.f32 %v631_v13, %v560_v30 }
 0x12d   : > { %v633_v56 = vadd.f32 %v1131_v12, %v632_v18  ;;  %v702_v20 = vadd.f32 %v701_v16, %v671_v7 }
 0x12f   : > { %v634_v23 = vadd.f32 %v1138_v22, %v633_v56  ;;  %v703_v24 = vadd.f32 %v702_v20, %v672_v19 }
 0x131   : > { %v635_v2 = vrot.slane %v634_v23, 4  ;;  %v704_v26 = vadd.f32 %v703_v24, %v673_v21 }
 0x133   : > { %v636_v17 = vadd.f32 %v635_v2, %v634_v23  ;;  %v705_v28 = vrot.slane %v704_v26, 4 }
 0x135   : > { %v637_v32 = vrot.slane %v636_v17, 2  ;;  %v706_v33 = vadd.f32 %v705_v28, %v704_v26 }
 0x137   : > { %v638_v30 = vadd.f32 %v637_v32, %v636_v17  ;;  %v707_v34 = vrot.slane %v706_v33, 2 }
 0x139   : > { %v639_v35 = vrot.slane %v638_v30, 1  ;;  %v708_v37 = vadd.f32 %v707_v34, %v706_v33 }
 0x13b   : > { %v640_v12 = vadd.f32 %v639_v35, %v638_v30  ;;  %v709_v38 = vrot.slane %v708_v37, 1 }
 0x13d   : > { %641 = vst [vmem:[%s214_s20] sm:$0x1] %v640_v12  ;;  %v710_v22 = vadd.f32 %v709_v38, %v708_v37 }
 0x13f   : > { %711 = vst [vmem:[%s217_s23] sm:$0x1] %v710_v22 }
 0x140 PF: > { %s15_s15 = sadd.s32 1, %s979_s15  }
 0x141   : > { %p12_p5 = scmp.ge.s32.totalorder %s15_s15, 4  }
 0x143   :  { %14 = sbr.rel (!%p12_p5) target bundleno = 1 (0x1), region = 82 }

// kernel: discriminator_forward.11
= control target key start
LH: loop header
LB: loop body
LE: loop exit
PB: predicated region body
PF: predicated region fallthrough
CT: control target
= control target key end

     0   :  { %s775_s1 = inlined_call_operand.vmem [shape: bf16[256,128], index: 1, kind: input, shape index: {}]   ;;  %s776_s0 = inlined_call_operand.vmem [shape: bf16[128,256], index: 0, kind: input, shape index: {}]   ;;  %s777_s2 = inlined_call_operand.vmem [shape: f32[128,128], index: 2, kind: output, shape index: {0}]   ;;  %s778_s3 = inlined_call_operand.vmem [shape: f32[1,1,128], index: 3, kind: output, shape index: {1}]   ;;  %s779_s4 = inlined_call_operand.vmem [shape: f32[1,1,128], index: 4, kind: output, shape index: {2}]  }
   0x1   :  { %v536_v0 = vld [vmem:[%s775_s1 + $0x78] sm:$0xff]   ;;  %v538_v2 = vld [vmem:[%s775_s1 + $0x70] sm:$0xff]   ;;  %v540_v4 = vld [vmem:[%s775_s1 + $0x68] sm:$0xff]  }
   0x2   :  { %v537_v1 = vld [vmem:[%s775_s1 + $0x38] sm:$0xff]   ;;  %456 = vmatprep.subr.bf16.mxu0 %v536_v0  ;;  %520 = vmatprep.subr.bf16.mxu1 %v536_v0  ;;  %v539_v3 = vld [vmem:[%s775_s1 + $0x30] sm:$0xff]   ;;  %v541_v5 = vld [vmem:[%s775_s1 + $0x28] sm:$0xff]  }
   0x3   :  { %457 = vmatpush3.bf16.msra.mxu0 %v537_v1  ;;  %528 = vmatpush3.bf16.msra.mxu1 %v537_v1  ;;  %v542_v6 = vld [vmem:[%s775_s1 + $0x60] sm:$0xff]   ;;  %v544_v8 = vld [vmem:[%s775_s1 + $0x58] sm:$0xff]   ;;  %v546_v10 = vld [vmem:[%s775_s1 + $0x50] sm:$0xff]  }
   0x4   :  { %458 = vmatprep.subr.bf16.mxu0 %v538_v2  ;;  %521 = vmatprep.subr.bf16.mxu1 %v538_v2  ;;  %v543_v7 = vld [vmem:[%s775_s1 + $0x20] sm:$0xff]   ;;  %v545_v9 = vld [vmem:[%s775_s1 + $0x18] sm:$0xff]   ;;  %v547_v12 = vld [vmem:[%s775_s1 + $0x10] sm:$0xff]  }
   0x5   :  { %v554_v11 = vld [vmem:[%s776_s0 + $0x4] ss:$8 sps:$4 sm:$0xff]   ;;  %v552_v18 = vld [vmem:[%s776_s0] ss:$8 sps:$4 sm:$0xff]   ;;  %v555_v20 = vld [vmem:[%s776_s0 + $0x14] ss:$8 sps:$4 sm:$0xff]  }
   0x6   :  { %v560_v13 = vld [vmem:[%s776_s0 + $0x44] ss:$8 sps:$4 sm:$0xff]   ;;  %271 = vmatprep.mubr.bf16.mxu0 %v554_v11  ;;  %v558_v19 = vld [vmem:[%s776_s0 + $0x40] ss:$8 sps:$4 sm:$0xff]   ;;  %v564_v21 = vld [vmem:[%s776_s0 + $0x54] ss:$8 sps:$4 sm:$0xff]  }
   0x7   :  { %459 = vmatpush3.bf16.msra.mxu0 %v539_v3  ;;  %529 = vmatpush3.bf16.msra.mxu1 %v539_v3  ;;  %v548_v14 = vld [vmem:[%s775_s1 + $0x48] sm:$0xff]   ;;  %v550_v16 = vld [vmem:[%s775_s1 + $0x40] sm:$0xff]   ;;  %v557_v22 = vld [vmem:[%s776_s0 + $0x10] ss:$8 sps:$4 sm:$0xff]  }
   0x8   :  { %460 = vmatprep.subr.bf16.mxu0 %v540_v4  ;;  %522 = vmatprep.subr.bf16.mxu1 %v540_v4  ;;  %v549_v15 = vld [vmem:[%s775_s1 + $0x8] sm:$0xff]   ;;  %v551_v17 = vld [vmem:[%s775_s1] sm:$0xff]   ;;  %v566_v23 = vld [vmem:[%s776_s0 + $0x50] ss:$8 sps:$4 sm:$0xff]  }
   0x9   :  { %303 = vmatprep.mubr.bf16.mxu1 %v560_v13  ;;  %v561_v24 = vld [vmem:[%s776_s0 + $0x24] ss:$8 sps:$4 sm:$0xff]   ;;  %v563_v26 = vld [vmem:[%s776_s0 + $0x20] ss:$8 sps:$4 sm:$0xff]   ;;  %v567_v28 = vld [vmem:[%s776_s0 + $0x34] ss:$8 sps:$4 sm:$0xff]  }
   0xa   :  { %v570_v25 = vld [vmem:[%s776_s0 + $0x64] ss:$8 sps:$4 sm:$0xff]   ;;  %v572_v27 = vld [vmem:[%s776_s0 + $0x60] ss:$8 sps:$4 sm:$0xff]   ;;  %v573_v29 = vld [vmem:[%s776_s0 + $0x74] ss:$8 sps:$4 sm:$0xff]  }
   0xb   :  { %461 = vmatpush3.bf16.msra.mxu0 %v541_v5  ;;  %530 = vmatpush3.bf16.msra.mxu1 %v541_v5  ;;  %v569_v30 = vld [vmem:[%s776_s0 + $0x30] ss:$8 sps:$4 sm:$0xff]  }
   0xc   :  { %462 = vmatprep.subr.bf16.mxu0 %v542_v6  ;;  %523 = vmatprep.subr.bf16.mxu1 %v542_v6  ;;  %v575_v31 = vld [vmem:[%s776_s0 + $0x70] ss:$8 sps:$4 sm:$0xff]  }
   0xf   :  { %463 = vmatpush3.bf16.msra.mxu0 %v543_v7  ;;  %531 = vmatpush3.bf16.msra.mxu1 %v543_v7 }
  0x10   :  { %464 = vmatprep.subr.bf16.mxu0 %v544_v8  ;;  %524 = vmatprep.subr.bf16.mxu1 %v544_v8 }
  0x13   :  { %465 = vmatpush3.bf16.msra.mxu0 %v545_v9  ;;  %532 = vmatpush3.bf16.msra.mxu1 %v545_v9 }
  0x14   :  { %466 = vmatprep.subr.bf16.mxu0 %v546_v10  ;;  %525 = vmatprep.subr.bf16.mxu1 %v546_v10 }
  0x17   :  { %467 = vmatpush3.bf16.msra.mxu0 %v547_v12  ;;  %533 = vmatpush3.bf16.msra.mxu1 %v547_v12 }
  0x18   :  { %468 = vmatprep.subr.bf16.mxu0 %v548_v14  ;;  %526 = vmatprep.subr.bf16.mxu1 %v548_v14 }
  0x1b   :  { %469 = vmatpush3.bf16.msra.mxu0 %v549_v15  ;;  %534 = vmatpush3.bf16.msra.mxu1 %v549_v15 }
  0x1c   :  { %470 = vmatprep.subr.bf16.mxu0 %v550_v16  ;;  %527 = vmatprep.subr.bf16.mxu1 %v550_v16 }
  0x1f   :  { %471 = vmatpush3.bf16.msra.mxu0 %v551_v17  ;;  %535 = vmatpush3.bf16.msra.mxu1 %v551_v17 }
  0x22   :  { %272 = vmatmul.mubr.bf16.vlgmr.msra.gmra.mxu0 %v552_v18  ;;  %304 = vmatmul.mubr.bf16.vlgmr.msra.gmra.mxu1 %v558_v19 }
  0x23   :  { %279 = vmatprep.mubr.bf16.mxu0 %v555_v20  ;;  %311 = vmatprep.mubr.bf16.mxu1 %v564_v21 }
  0x2a   :  { %280 = vmatmul.mubr.bf16.gmra.mxu0 %v557_v22  ;;  %312 = vmatmul.mubr.bf16.gmra.mxu1 %v566_v23 }
  0x2b   :  { %287 = vmatprep.mubr.bf16.mxu0 %v561_v24  ;;  %319 = vmatprep.mubr.bf16.mxu1 %v570_v25 }
  0x32   :  { %288 = vmatmul.mubr.bf16.gmra.mxu0 %v563_v26  ;;  %320 = vmatmul.mubr.bf16.gmra.mxu1 %v572_v27 }
  0x33   :  { %295 = vmatprep.mubr.bf16.mxu0 %v567_v28  ;;  %327 = vmatprep.mubr.bf16.mxu1 %v573_v29 }
  0x3a   :  { %296 = vmatmul.mubr.bf16.gmra.mxu0 %v569_v30  ;;  %328 = vmatmul.mubr.bf16.gmra.mxu1 %v575_v31 }
  0xe2   :  { %v472_v32 = vpop.f32.mrf.mxu0  ;;  %v496_v33 = vpop.f32.mrf.mxu1 }
  0xe4   :  { %v473_v34 = vpop.f32.mrf.mxu0  ;;  %v497_v35 = vpop.f32.mrf.mxu1 }
  0xe5   :  { %v474_v36 = vadd.f32 %v473_v34, %v472_v32  ;;  %v697_v37 = vadd.f32 %v497_v35, %v496_v33 }
  0xe6   :  { %v475_v38 = vpop.f32.mrf.mxu0  ;;  %v499_v39 = vpop.f32.mrf.mxu1 }
  0xe7   :  { %336 = vst [vmem:[%s777_s2] sm:$0xff] %v474_v36  ;;  %344 = vst [vmem:[%s777_s2 + $0x40] sm:$0xff] %v697_v37  ;;  %v374_v63 = vmul.f32 %v474_v36, %v474_v36 }
  0xe8   :  { %v476_v40 = vpop.f32.mrf.mxu0  ;;  %v500_v41 = vpop.f32.mrf.mxu1 }
  0xe9   :  { %v477_v42 = vadd.f32 %v476_v40, %v475_v38  ;;  %v706_v43 = vadd.f32 %v500_v41, %v499_v39  ;;  %v382_v38 = vmul.f32 %v697_v37, %v697_v37 }
  0xea   :  { %v478_v44 = vpop.f32.mrf.mxu0  ;;  %v502_v45 = vpop.f32.mrf.mxu1 }
  0xeb   :  { %337 = vst [vmem:[%s777_s2 + $0x8] sm:$0xff] %v477_v42  ;;  %345 = vst [vmem:[%s777_s2 + $0x48] sm:$0xff] %v706_v43  ;;  %v375_v58 = vmul.f32 %v477_v42, %v477_v42  ;;  %v352_v3 = vadd.f32 %v477_v42, %v474_v36  ;;  %v383_v41 = vmul.f32 %v706_v43, %v706_v43 }
  0xec   :  { %v479_v46 = vpop.f32.mrf.mxu0  ;;  %v503_v47 = vpop.f32.mrf.mxu1 }
  0xed   :  { %v480_v48 = vadd.f32 %v479_v46, %v478_v44  ;;  %v715_v49 = vadd.f32 %v503_v47, %v502_v45  ;;  %v390_v4 = vadd.f32 %v375_v58, %v374_v63 }
  0xee   :  { %v481_v50 = vpop.f32.mrf.mxu0  ;;  %v505_v51 = vpop.f32.mrf.mxu1 }
  0xef   :  { %338 = vst [vmem:[%s777_s2 + $0x10] sm:$0xff] %v480_v48  ;;  %346 = vst [vmem:[%s777_s2 + $0x50] sm:$0xff] %v715_v49  ;;  %v376_v0 = vmul.f32 %v480_v48, %v480_v48  ;;  %v353_v8 = vadd.f32 %v480_v48, %v352_v3  ;;  %v384_v45 = vmul.f32 %v715_v49, %v715_v49 }
  0xf0   :  { %v482_v52 = vpop.f32.mrf.mxu0  ;;  %v506_v53 = vpop.f32.mrf.mxu1 }
  0xf1   :  { %v483_v54 = vadd.f32 %v482_v52, %v481_v50  ;;  %v724_v55 = vadd.f32 %v506_v53, %v505_v51  ;;  %v391_v11 = vadd.f32 %v390_v4, %v376_v0 }
  0xf2   :  { %v484_v56 = vpop.f32.mrf.mxu0  ;;  %v508_v57 = vpop.f32.mrf.mxu1 }
  0xf3   :  { %339 = vst [vmem:[%s777_s2 + $0x18] sm:$0xff] %v483_v54  ;;  %347 = vst [vmem:[%s777_s2 + $0x58] sm:$0xff] %v724_v55  ;;  %v377_v5 = vmul.f32 %v483_v54, %v483_v54  ;;  %v354_v14 = vadd.f32 %v483_v54, %v353_v8  ;;  %v385_v48 = vmul.f32 %v724_v55, %v724_v55 }
  0xf4   :  { %v485_v59 = vpop.f32.mrf.mxu0  ;;  %v509_v60 = vpop.f32.mrf.mxu1 }
  0xf5   :  { %v486_v61 = vadd.f32 %v485_v59, %v484_v56  ;;  %v510_v62 = vadd.f32 %v509_v60, %v508_v57  ;;  %v392_v16 = vadd.f32 %v391_v11, %v377_v5 }
  0xf6   :  { %v487_v1 = vpop.f32.mrf.mxu0  ;;  %v511_v2 = vpop.f32.mrf.mxu1 }
  0xf7   :  { %340 = vst [vmem:[%s777_s2 + $0x20] sm:$0xff] %v486_v61  ;;  %348 = vst [vmem:[%s777_s2 + $0x60] sm:$0xff] %v510_v62  ;;  %v378_v15 = vmul.f32 %v486_v61, %v486_v61  ;;  %v355_v19 = vadd.f32 %v486_v61, %v354_v14 }
  0xf8   :  { %v488_v6 = vpop.f32.mrf.mxu0  ;;  %v512_v7 = vpop.f32.mrf.mxu1 }
  0xf9   :  { %v489_v9 = vadd.f32 %v488_v6, %v487_v1  ;;  %v513_v10 = vadd.f32 %v512_v7, %v511_v2  ;;  %v393_v25 = vadd.f32 %v392_v16, %v378_v15 }
  0xfa   :  { %v490_v12 = vpop.f32.mrf.mxu0  ;;  %v514_v13 = vpop.f32.mrf.mxu1 }
  0xfb   :  { %341 = vst [vmem:[%s777_s2 + $0x28] sm:$0xff] %v489_v9  ;;  %349 = vst [vmem:[%s777_s2 + $0x68] sm:$0xff] %v513_v10  ;;  %v379_v20 = vmul.f32 %v489_v9, %v489_v9  ;;  %v356_v26 = vadd.f32 %v489_v9, %v355_v19  ;;  %v387_v56 = vmul.f32 %v513_v10, %v513_v10 }
  0xfc   :  { %v491_v17 = vpop.f32.mrf.mxu0  ;;  %v515_v18 = vpop.f32.mrf.mxu1 }
  0xfd   :  { %v492_v21 = vadd.f32 %v491_v17, %v490_v12  ;;  %v516_v22 = vadd.f32 %v515_v18, %v514_v13  ;;  %v394_v30 = vadd.f32 %v393_v25, %v379_v20 }
  0xfe   :  { %v493_v23 = vpop.f32.mrf.mxu0  ;;  %v517_v24 = vpop.f32.mrf.mxu1 }
  0xff   :  { %342 = vst [vmem:[%s777_s2 + $0x30] sm:$0xff] %v492_v21  ;;  %v380_v27 = vmul.f32 %v492_v21, %v492_v21  ;;  %350 = vst [vmem:[%s777_s2 + $0x70] sm:$0xff] %v516_v22  ;;  %v357_v31 = vadd.f32 %v492_v21, %v356_v26  ;;  %v388_v59 = vmul.f32 %v516_v22, %v516_v22 }
 0x100   :  { %v494_v28 = vpop.f32.mrf.mxu0  ;;  %v518_v29 = vpop.f32.mrf.mxu1 }
 0x101   :  { %v495_v32 = vadd.f32 %v494_v28, %v493_v23  ;;  %v519_v33 = vadd.f32 %v518_v29, %v517_v24  ;;  %v395_v34 = vadd.f32 %v394_v30, %v380_v27 }
 0x103   :  { %343 = vst [vmem:[%s777_s2 + $0x38] sm:$0xff] %v495_v32  ;;  %v358_v35 = vadd.f32 %v495_v32, %v357_v31  ;;  %v381_v36 = vmul.f32 %v495_v32, %v495_v32  ;;  %351 = vst [vmem:[%s777_s2 + $0x78] sm:$0xff] %v519_v33  ;;  %v389_v63 = vmul.f32 %v519_v33, %v519_v33 }
 0x105   :  { %v359_v39 = vadd.f32 %v697_v37, %v358_v35  ;;  %v396_v40 = vadd.f32 %v395_v34, %v381_v36  ;;  %v386_v37 = vmul.f32 %v510_v62, %v510_v62 }
 0x107   :  { %v360_v42 = vadd.f32 %v706_v43, %v359_v39  ;;  %v397_v44 = vadd.f32 %v396_v40, %v382_v38 }
 0x109   :  { %v398_v46 = vadd.f32 %v397_v44, %v383_v41  ;;  %v361_v47 = vadd.f32 %v715_v49, %v360_v42 }
 0x10b   :  { %v362_v50 = vadd.f32 %v724_v55, %v361_v47  ;;  %v399_v51 = vadd.f32 %v398_v46, %v384_v45 }
 0x10d   :  { %v363_v52 = vadd.f32 %v510_v62, %v362_v50  ;;  %v400_v53 = vadd.f32 %v399_v51, %v385_v48 }
 0x10f   :  { %v364_v54 = vadd.f32 %v513_v10, %v363_v52  ;;  %v401_v57 = vadd.f32 %v400_v53, %v386_v37 }
 0x111   :  { %v402_v43 = vadd.f32 %v401_v57, %v387_v56  ;;  %v365_v58 = vadd.f32 %v516_v22, %v364_v54 }
 0x113   :  { %v403_v60 = vadd.f32 %v402_v43, %v388_v59  ;;  %v366_v61 = vadd.f32 %v519_v33, %v365_v58 }
 0x115   :  { %v367_v0 = vrot.slane %v366_v61, 4  ;;  %v404_v49 = vadd.f32 %v403_v60, %v389_v63 }
 0x117   :  { %v368_v1 = vadd.f32 %v367_v0, %v366_v61  ;;  %v405_v2 = vrot.slane %v404_v49, 4 }
 0x119   :  { %v369_v3 = vrot.slane %v368_v1, 2  ;;  %v406_v4 = vadd.f32 %v405_v2, %v404_v49 }
 0x11b   :  { %v370_v55 = vadd.f32 %v369_v3, %v368_v1  ;;  %v407_v5 = vrot.slane %v406_v4, 2 }
 0x11d   :  { %v371_v6 = vrot.slane %v370_v55, 1  ;;  %v408_v62 = vadd.f32 %v407_v5, %v406_v4 }
 0x11f   :  { %v372_v7 = vadd.f32 %v371_v6, %v370_v55  ;;  %v409_v8 = vrot.slane %v408_v62, 1 }
 0x121   :  { %373 = vst [vmem:[%s778_s3] sm:$0x1] %v372_v7  ;;  %v410_v9 = vadd.f32 %v409_v8, %v408_v62 }
 0x123   :  { %411 = vst [vmem:[%s779_s4] sm:$0x1] %v410_v9 }

// kernel: discriminator_forward.12
= control target key start
LH: loop header
LB: loop body
LE: loop exit
PB: predicated region body
PF: predicated region fallthrough
CT: control target
= control target key end

     0   :  { %s423_s0 = inlined_call_operand.vmem [shape: f32[128,128], index: 0, kind: input, shape index: {}]   ;;  %s424_s1 = inlined_call_operand.vmem [shape: f32[1,128], index: 1, kind: input, shape index: {}]   ;;  %s425_s2 = inlined_call_operand.vmem [shape: f32[1,128], index: 2, kind: input, shape index: {}]   ;;  %s426_s3 = inlined_call_operand.vmem [shape: bf16[128,128], index: 3, kind: output, shape index: {}]  }
   0x1   :  { %v14_v0 = vld [vmem:[%s423_s0] sm:$0xff]  ;;  %v15_v1 = vld [vmem:[%s423_s0 + $0x8] sm:$0xff]  ;;  %v16_v6 = vld [vmem:[%s423_s0 + $0x10] sm:$0xff] }
   0x2   :  { %v318_v2 = vld [vmem:[%s424_s1] ss:$0 sm:$0xff]  ;;  %v17_v7 = vld [vmem:[%s423_s0 + $0x18] sm:$0xff]  ;;  %v19_v11 = vld [vmem:[%s423_s0 + $0x28] sm:$0xff] }
   0x3   :  { %v37_v3 = vmul.f32 %v318_v2, %v14_v0  ;;  %v38_v4 = vmul.f32 %v318_v2, %v15_v1  ;;  %v325_v5 = vld [vmem:[%s425_s2] ss:$0 sm:$0xff]  ;;  %v39_v8 = vmul.f32 %v318_v2, %v16_v6  ;;  %v40_v9 = vmul.f32 %v318_v2, %v17_v7  ;;  %v20_v12 = vld [vmem:[%s423_s0 + $0x30] sm:$0xff]  ;;  %v21_v17 = vld [vmem:[%s423_s0 + $0x38] sm:$0xff] }
   0x4   :  { %v18_v10 = vld [vmem:[%s423_s0 + $0x20] sm:$0xff]  ;;  %v42_v16 = vmul.f32 %v318_v2, %v19_v11  ;;  %v43_v20 = vmul.f32 %v318_v2, %v20_v12  ;;  %v44_v21 = vmul.f32 %v318_v2, %v21_v17  ;;  %v23_v35 = vld [vmem:[%s423_s0 + $0x48] sm:$0xff]  ;;  %v24_v36 = vld [vmem:[%s423_s0 + $0x50] sm:$0xff] }
   0x5   :  { %v60_v13 = vadd.f32 %v325_v5, %v37_v3  ;;  %v61_v14 = vadd.f32 %v325_v5, %v38_v4  ;;  %v41_v15 = vmul.f32 %v318_v2, %v18_v10  ;;  %v62_v18 = vadd.f32 %v325_v5, %v39_v8  ;;  %v22_v34 = vld [vmem:[%s423_s0 + $0x40] sm:$0xff]  ;;  %v25_v42 = vld [vmem:[%s423_s0 + $0x58] sm:$0xff]  ;;  %v27_v48 = vld [vmem:[%s423_s0 + $0x68] sm:$0xff] }
   0x6   :  { %v63_v19 = vadd.f32 %v325_v5, %v40_v9  ;;  %v65_v29 = vadd.f32 %v325_v5, %v42_v16  ;;  %v66_v33 = vadd.f32 %v325_v5, %v43_v20  ;;  %v67_v40 = vadd.f32 %v325_v5, %v44_v21  ;;  %v26_v47 = vld [vmem:[%s423_s0 + $0x60] sm:$0xff]  ;;  %v28_v60 = vld [vmem:[%s423_s0 + $0x70] sm:$0xff]  ;;  %v29_v7 = vld [vmem:[%s423_s0 + $0x78] sm:$0xff] }
   0x7   :  { %vm76_vm0 = vcmp.ge.f32.partialorder %v60_v13, 0.0  ;;  %vm77_vm1 = vcmp.ge.f32.partialorder %v61_v14, 0.0  ;;  %v92_v22 = vmul.f32 0.2, %v60_v13  ;;  %v93_v23 = vmul.f32 0.2, %v61_v14 }
   0x8   :  { %vm78_vm2 = vcmp.ge.f32.partialorder %v62_v18, 0.0  ;;  %vm79_vm3 = vcmp.ge.f32.partialorder %v63_v19, 0.0  ;;  %v94_v24 = vmul.f32 0.2, %v62_v18  ;;  %v95_v25 = vmul.f32 0.2, %v63_v19 }
   0x9   :  { %v108_v26 = vsel %vm76_vm0, %v60_v13, %v92_v22  ;;  %v109_v27 = vsel %vm77_vm1, %v61_v14, %v93_v23  ;;  %v64_v28 = vadd.f32 %v325_v5, %v41_v15  ;;  %vm81_vm5 = vcmp.ge.f32.partialorder %v65_v29, 0.0 }
   0xa   :  { %v245_v30 = vpack.c.bf16 %v109_v27, %v108_v26  ;;  %v110_v31 = vsel %vm78_vm2, %v62_v18, %v94_v24  ;;  %v111_v32 = vsel %vm79_vm3, %v63_v19, %v95_v25  ;;  %v97_v39 = vmul.f32 0.2, %v65_v29 }
   0xb   :  { %v250_v37 = vpack.c.bf16 %v111_v32, %v110_v31  ;;  %vm80_vm4 = vcmp.ge.f32.partialorder %v64_v28, 0.0  ;;  %v96_v38 = vmul.f32 0.2, %v64_v28  ;;  %vm82_vm6 = vcmp.ge.f32.partialorder %v66_v33, 0.0 }
   0xc   :  { %246 = vst [vmem:[%s426_s3] sm:$0xff] %v245_v30   ;;  %v98_v41 = vmul.f32 0.2, %v66_v33  ;;  %v45_v44 = vmul.f32 %v318_v2, %v22_v34  ;;  %v46_v45 = vmul.f32 %v318_v2, %v23_v35  ;;  %v47_v46 = vmul.f32 %v318_v2, %v24_v36 }
   0xd   :  { %282 = vst [vmem:[%s426_s3 + $0x8] sm:$0xff] %v250_v37   ;;  %v112_v43 = vsel %vm80_vm4, %v64_v28, %v96_v38  ;;  %v113_v49 = vsel %vm81_vm5, %v65_v29, %v97_v39  ;;  %vm83_vm7 = vcmp.ge.f32.partialorder %v67_v40, 0.0  ;;  %v99_v50 = vmul.f32 0.2, %v67_v40 }
   0xe   :  { %v114_v51 = vsel %vm82_vm6, %v66_v33, %v98_v41  ;;  %v255_v52 = vpack.c.bf16 %v113_v49, %v112_v43  ;;  %v68_v53 = vadd.f32 %v325_v5, %v45_v44  ;;  %v69_v54 = vadd.f32 %v325_v5, %v46_v45 }
   0xf   :  { %v48_v55 = vmul.f32 %v318_v2, %v25_v42  ;;  %v115_v56 = vsel %vm83_vm7, %v67_v40, %v99_v50  ;;  %v70_v57 = vadd.f32 %v325_v5, %v47_v46  ;;  %v49_v58 = vmul.f32 %v318_v2, %v26_v47 }
  0x10   :  { %v50_v59 = vmul.f32 %v318_v2, %v27_v48  ;;  %283 = vst [vmem:[%s426_s3 + $0x10] sm:$0xff] %v255_v52   ;;  %v260_v61 = vpack.c.bf16 %v115_v56, %v114_v51  ;;  %vm84_vm8 = vcmp.ge.f32.partialorder %v68_v53, 0.0  ;;  %vm85_vm9 = vcmp.ge.f32.partialorder %v69_v54, 0.0 }
  0x11   :  { %v100_v62 = vmul.f32 0.2, %v68_v53  ;;  %v101_v63 = vmul.f32 0.2, %v69_v54  ;;  %v71_v0 = vadd.f32 %v325_v5, %v48_v55  ;;  %vm86_vm10 = vcmp.ge.f32.partialorder %v70_v57, 0.0 }
  0x12   :  { %v102_v1 = vmul.f32 0.2, %v70_v57  ;;  %284 = vst [vmem:[%s426_s3 + $0x18] sm:$0xff] %v260_v61   ;;  %v72_v4 = vadd.f32 %v325_v5, %v49_v58  ;;  %v73_v6 = vadd.f32 %v325_v5, %v50_v59  ;;  %v51_v8 = vmul.f32 %v318_v2, %v28_v60 }
  0x13   :  { %v116_v3 = vsel %vm84_vm8, %v68_v53, %v100_v62  ;;  %v117_v9 = vsel %vm85_vm9, %v69_v54, %v101_v63  ;;  %vm87_vm11 = vcmp.ge.f32.partialorder %v71_v0, 0.0  ;;  %v103_v10 = vmul.f32 0.2, %v71_v0 }
  0x14   :  { %v118_v11 = vsel %vm86_vm10, %v70_v57, %v102_v1  ;;  %v265_v12 = vpack.c.bf16 %v117_v9, %v116_v3  ;;  %vm88_vm12 = vcmp.ge.f32.partialorder %v72_v4, 0.0  ;;  %vm89_vm13 = vcmp.ge.f32.partialorder %v73_v6, 0.0 }
  0x15   :  { %v104_v13 = vmul.f32 0.2, %v72_v4  ;;  %v119_v14 = vsel %vm87_vm11, %v71_v0, %v103_v10  ;;  %v105_v15 = vmul.f32 0.2, %v73_v6  ;;  %v52_v16 = vmul.f32 %v318_v2, %v29_v7 }
  0x16   :  { %v74_v17 = vadd.f32 %v325_v5, %v51_v8  ;;  %285 = vst [vmem:[%s426_s3 + $0x20] sm:$0xff] %v265_v12   ;;  %v270_v18 = vpack.c.bf16 %v119_v14, %v118_v11 }
  0x17   :  { %v120_v19 = vsel %vm88_vm12, %v72_v4, %v104_v13  ;;  %v121_v20 = vsel %vm89_vm13, %v73_v6, %v105_v15  ;;  %v75_v21 = vadd.f32 %v325_v5, %v52_v16 }
  0x18   :  { %vm90_vm14 = vcmp.ge.f32.partialorder %v74_v17, 0.0  ;;  %v106_v22 = vmul.f32 0.2, %v74_v17  ;;  %286 = vst [vmem:[%s426_s3 + $0x28] sm:$0xff] %v270_v18   ;;  %v275_v23 = vpack.c.bf16 %v121_v20, %v120_v19 }
  0x19   :  { %vm91_vm15 = vcmp.ge.f32.partialorder %v75_v21, 0.0  ;;  %v107_v2 = vmul.f32 0.2, %v75_v21 }
  0x1a   :  { %v122_v24 = vsel %vm90_vm14, %v74_v17, %v106_v22  ;;  %287 = vst [vmem:[%s426_s3 + $0x30] sm:$0xff] %v275_v23  }
  0x1b   :  { %v123_v25 = vsel %vm91_vm15, %v75_v21, %v107_v2 }
  0x1c   :  { %v280_v26 = vpack.c.bf16 %v123_v25, %v122_v24 }
  0x1e   :  { %288 = vst [vmem:[%s426_s3 + $0x38] sm:$0xff] %v280_v26  }

// kernel: discriminator_forward.13
= control target key start
LH: loop header
LB: loop body
LE: loop exit
PB: predicated region body
PF: predicated region fallthrough
CT: control target
= control target key end

     0   :  { %s760_s1 = inlined_call_operand.vmem [shape: bf16[512,128], index: 1, kind: input, shape index: {}]   ;;  %s761_s0 = inlined_call_operand.vmem [shape: bf16[32,512], index: 0, kind: input, shape index: {}]   ;;  %s762_s2 = inlined_call_operand.vmem [shape: f32[32,128], index: 2, kind: output, shape index: {0}]   ;;  %s763_s3 = inlined_call_operand.vmem [shape: f32[1,1,128], index: 3, kind: output, shape index: {1}]   ;;  %s764_s4 = inlined_call_operand.vmem [shape: f32[1,1,128], index: 4, kind: output, shape index: {2}]  }
   0x1   :  { %v553_v0 = vld [vmem:[%s760_s1 + $0x78] sm:$0xff]   ;;  %v557_v4 = vld [vmem:[%s760_s1 + $0x70] sm:$0xff]   ;;  %v561_v8 = vld [vmem:[%s760_s1 + $0x68] sm:$0xff]  }
   0x2   :  { %v554_v1 = vld [vmem:[%s760_s1 + $0xf8] sm:$0xff]   ;;  %497 = vmatprep.subr.bf16.mxu0 %v553_v0  ;;  %v558_v5 = vld [vmem:[%s760_s1 + $0xf0] sm:$0xff]   ;;  %v562_v9 = vld [vmem:[%s760_s1 + $0xe8] sm:$0xff]  }
   0x3   :  { %v555_v2 = vld [vmem:[%s760_s1 + $0x38] sm:$0xff]   ;;  %525 = vmatprep.subr.bf16.mxu1 %v554_v1  ;;  %v559_v6 = vld [vmem:[%s760_s1 + $0x30] sm:$0xff]   ;;  %v563_v10 = vld [vmem:[%s760_s1 + $0x28] sm:$0xff]  }
   0x4   :  { %v556_v3 = vld [vmem:[%s760_s1 + $0xb8] sm:$0xff]   ;;  %498 = vmatpush3.bf16.msra.mxu0 %v555_v2  ;;  %v560_v7 = vld [vmem:[%s760_s1 + $0xb0] sm:$0xff]   ;;  %v564_v11 = vld [vmem:[%s760_s1 + $0xa8] sm:$0xff]  }
   0x5   :  { %526 = vmatpush3.bf16.msra.mxu1 %v556_v3  ;;  %499 = vmatprep.subr.bf16.mxu0 %v557_v4  ;;  %v565_v12 = vld [vmem:[%s760_s1 + $0x60] sm:$0xff]   ;;  %v569_v16 = vld [vmem:[%s760_s1 + $0x58] sm:$0xff]   ;;  %v573_v20 = vld [vmem:[%s760_s1 + $0x50] sm:$0xff]  }
   0x6   :  { %527 = vmatprep.subr.bf16.mxu1 %v558_v5  ;;  %v566_v13 = vld [vmem:[%s760_s1 + $0xe0] sm:$0xff]   ;;  %v570_v17 = vld [vmem:[%s760_s1 + $0xd8] sm:$0xff]   ;;  %v574_v21 = vld [vmem:[%s760_s1 + $0xd0] sm:$0xff]  }
   0x7   :  { %v567_v14 = vld [vmem:[%s760_s1 + $0x20] sm:$0xff]   ;;  %v571_v18 = vld [vmem:[%s760_s1 + $0x18] sm:$0xff]   ;;  %v575_v22 = vld [vmem:[%s760_s1 + $0x10] sm:$0xff]  }
   0x8   :  { %500 = vmatpush3.bf16.msra.mxu0 %v559_v6  ;;  %v568_v15 = vld [vmem:[%s760_s1 + $0xa0] sm:$0xff]   ;;  %v572_v19 = vld [vmem:[%s760_s1 + $0x98] sm:$0xff]   ;;  %v576_v23 = vld [vmem:[%s760_s1 + $0x90] sm:$0xff]  }
   0x9   :  { %528 = vmatpush3.bf16.msra.mxu1 %v560_v7  ;;  %501 = vmatprep.subr.bf16.mxu0 %v561_v8  ;;  %v577_v24 = vld [vmem:[%s760_s1 + $0x48] sm:$0xff]   ;;  %v581_v28 = vld [vmem:[%s760_s1 + $0x40] sm:$0xff]  }
   0xa   :  { %529 = vmatprep.subr.bf16.mxu1 %v562_v9  ;;  %v578_v25 = vld [vmem:[%s760_s1 + $0xc8] sm:$0xff]   ;;  %v582_v29 = vld [vmem:[%s760_s1 + $0xc0] sm:$0xff]  }
   0xb   :  { %v579_v26 = vld [vmem:[%s760_s1 + $0x8] sm:$0xff]   ;;  %v583_v30 = vld [vmem:[%s760_s1] sm:$0xff]  }
   0xc   :  { %502 = vmatpush3.bf16.msra.mxu0 %v563_v10  ;;  %v580_v27 = vld [vmem:[%s760_s1 + $0x88] sm:$0xff]   ;;  %v584_v31 = vld [vmem:[%s760_s1 + $0x80] sm:$0xff]  }
   0xd   :  { %530 = vmatpush3.bf16.msra.mxu1 %v564_v11  ;;  %503 = vmatprep.subr.bf16.mxu0 %v565_v12  ;;  %v585_v32 = vld [vmem:[%s761_s0] ss:$16 sps:$4 sm:$0xff]   ;;  %v587_v33 = vld [vmem:[%s761_s0 + $0x4] ss:$16 sps:$4 sm:$0xff]   ;;  %v588_v34 = vld [vmem:[%s761_s0 + $0x8] ss:$16 sps:$4 sm:$0xff]  }
   0xe   :  { %531 = vmatprep.subr.bf16.mxu1 %v566_v13  ;;  %v590_v35 = vld [vmem:[%s761_s0 + $0xc] ss:$16 sps:$4 sm:$0xff]   ;;  %351 = vmatprep.mubr.bf16.mxu0 %v587_v33  ;;  %v591_v36 = vld [vmem:[%s761_s0 + $0x24] ss:$16 sps:$4 sm:$0xff]   ;;  %v595_v38 = vld [vmem:[%s761_s0 + $0x20] ss:$16 sps:$4 sm:$0xff]  }
   0xf   :  { %400 = vmatprep.mubr.bf16.mxu1 %v590_v35  ;;  %v593_v37 = vld [vmem:[%s761_s0 + $0x2c] ss:$16 sps:$4 sm:$0xff]   ;;  %v596_v39 = vld [vmem:[%s761_s0 + $0x28] ss:$16 sps:$4 sm:$0xff]  }
  0x10   :  { %504 = vmatpush3.bf16.msra.mxu0 %v567_v14 }
  0x11   :  { %532 = vmatpush3.bf16.msra.mxu1 %v568_v15  ;;  %505 = vmatprep.subr.bf16.mxu0 %v569_v16 }
  0x12   :  { %533 = vmatprep.subr.bf16.mxu1 %v570_v17 }
  0x14   :  { %506 = vmatpush3.bf16.msra.mxu0 %v571_v18 }
  0x15   :  { %534 = vmatpush3.bf16.msra.mxu1 %v572_v19  ;;  %507 = vmatprep.subr.bf16.mxu0 %v573_v20 }
  0x16   :  { %535 = vmatprep.subr.bf16.mxu1 %v574_v21 }
  0x18   :  { %508 = vmatpush3.bf16.msra.mxu0 %v575_v22 }
  0x19   :  { %536 = vmatpush3.bf16.msra.mxu1 %v576_v23  ;;  %509 = vmatprep.subr.bf16.mxu0 %v577_v24 }
  0x1a   :  { %537 = vmatprep.subr.bf16.mxu1 %v578_v25 }
  0x1c   :  { %510 = vmatpush3.bf16.msra.mxu0 %v579_v26 }
  0x1d   :  { %538 = vmatpush3.bf16.msra.mxu1 %v580_v27  ;;  %511 = vmatprep.subr.bf16.mxu0 %v581_v28 }
  0x1e   :  { %539 = vmatprep.subr.bf16.mxu1 %v582_v29 }
  0x20   :  { %512 = vmatpush3.bf16.msra.mxu0 %v583_v30 }
  0x21   :  { %540 = vmatpush3.bf16.msra.mxu1 %v584_v31 }
  0x23   :  { %352 = vmatmul.mubr.bf16.vlgmr.msra.gmra.mxu0 %v585_v32 }
  0x24   :  { %401 = vmatmul.mubr.bf16.vlgmr.msra.gmra.mxu1 %v588_v34  ;;  %359 = vmatprep.mubr.bf16.mxu0 %v591_v36 }
  0x25   :  { %408 = vmatprep.mubr.bf16.mxu1 %v593_v37 }
  0x2b   :  { %360 = vmatmul.mubr.bf16.gmra.mxu0 %v595_v38 }
  0x2c   :  { %409 = vmatmul.mubr.bf16.gmra.mxu1 %v596_v39 }
  0xe3   :  { %v513_v40 = vpop.f32.mrf.mxu0 }
  0xe4   :  { %v541_v41 = vpop.f32.mrf.mxu1 }
  0xe5   :  { %v514_v42 = vpop.f32.mrf.mxu0 }
  0xe6   :  { %v515_v43 = vadd.f32 %v514_v42, %v513_v40  ;;  %v542_v44 = vpop.f32.mrf.mxu1 }
  0xe7   :  { %v543_v45 = vadd.f32 %v542_v44, %v541_v41  ;;  %v516_v46 = vpop.f32.mrf.mxu0 }
  0xe8   :  { %v544_v47 = vpop.f32.mrf.mxu1 }
  0xe9   :  { %v403_v48 = vadd.f32 %v543_v45, %v515_v43  ;;  %v517_v49 = vpop.f32.mrf.mxu0 }
  0xea   :  { %v518_v50 = vadd.f32 %v517_v49, %v516_v46  ;;  %v545_v51 = vpop.f32.mrf.mxu1 }
  0xeb   :  { %417 = vst [vmem:[%s762_s2] sm:$0xff] %v403_v48  ;;  %v546_v52 = vadd.f32 %v545_v51, %v544_v47  ;;  %v519_v53 = vpop.f32.mrf.mxu0  ;;  %v431_v3 = vmul.f32 %v403_v48, %v403_v48 }
  0xec   :  { %v547_v54 = vpop.f32.mrf.mxu1 }
  0xed   :  { %v406_v55 = vadd.f32 %v546_v52, %v518_v50  ;;  %v520_v56 = vpop.f32.mrf.mxu0 }
  0xee   :  { %v521_v57 = vadd.f32 %v520_v56, %v519_v53  ;;  %v548_v58 = vpop.f32.mrf.mxu1 }
  0xef   :  { %418 = vst [vmem:[%s762_s2 + $0x8] sm:$0xff] %v406_v55  ;;  %v549_v59 = vadd.f32 %v548_v58, %v547_v54  ;;  %v522_v60 = vpop.f32.mrf.mxu0  ;;  %v432_v62 = vmul.f32 %v406_v55, %v406_v55  ;;  %v421_v4 = vadd.f32 %v406_v55, %v403_v48 }
  0xf0   :  { %v550_v61 = vpop.f32.mrf.mxu1 }
  0xf1   :  { %v411_v63 = vadd.f32 %v549_v59, %v521_v57  ;;  %v523_v0 = vpop.f32.mrf.mxu0  ;;  %v435_v7 = vadd.f32 %v432_v62, %v431_v3 }
  0xf2   :  { %v524_v1 = vadd.f32 %v523_v0, %v522_v60  ;;  %v551_v2 = vpop.f32.mrf.mxu1 }
  0xf3   :  { %419 = vst [vmem:[%s762_s2 + $0x10] sm:$0xff] %v411_v63  ;;  %v433_v5 = vmul.f32 %v411_v63, %v411_v63  ;;  %v552_v6 = vadd.f32 %v551_v2, %v550_v61  ;;  %v422_v8 = vadd.f32 %v421_v4, %v411_v63 }
  0xf5   :  { %v414_v9 = vadd.f32 %v552_v6, %v524_v1  ;;  %v436_v10 = vadd.f32 %v435_v7, %v433_v5 }
  0xf7   :  { %420 = vst [vmem:[%s762_s2 + $0x18] sm:$0xff] %v414_v9  ;;  %v423_v11 = vadd.f32 %v422_v8, %v414_v9  ;;  %v434_v12 = vmul.f32 %v414_v9, %v414_v9 }
  0xf9   :  { %v424_v13 = vrot.slane %v423_v11, 4  ;;  %v437_v14 = vadd.f32 %v436_v10, %v434_v12 }
  0xfb   :  { %v425_v15 = vadd.f32 %v424_v13, %v423_v11  ;;  %v438_v16 = vrot.slane %v437_v14, 4 }
  0xfd   :  { %v426_v17 = vrot.slane %v425_v15, 2  ;;  %v439_v18 = vadd.f32 %v438_v16, %v437_v14 }
  0xff   :  { %v427_v19 = vadd.f32 %v426_v17, %v425_v15  ;;  %v440_v20 = vrot.slane %v439_v18, 2 }
 0x101   :  { %v428_v21 = vrot.slane %v427_v19, 1  ;;  %v441_v22 = vadd.f32 %v440_v20, %v439_v18 }
 0x103   :  { %v429_v23 = vadd.f32 %v428_v21, %v427_v19  ;;  %v442_v24 = vrot.slane %v441_v22, 1 }
 0x105   :  { %430 = vst [vmem:[%s763_s3] sm:$0x1] %v429_v23  ;;  %v443_v25 = vadd.f32 %v442_v24, %v441_v22 }
 0x107   :  { %444 = vst [vmem:[%s764_s4] sm:$0x1] %v443_v25 }

// kernel: discriminator_forward.14
= control target key start
LH: loop header
LB: loop body
LE: loop exit
PB: predicated region body
PF: predicated region fallthrough
CT: control target
= control target key end

     0   :  { %s141_s0 = inlined_call_operand.vmem [shape: f32[32,128], index: 0, kind: input, shape index: {}]   ;;  %s142_s1 = inlined_call_operand.vmem [shape: f32[1,128], index: 1, kind: input, shape index: {}]   ;;  %s143_s2 = inlined_call_operand.vmem [shape: f32[1,128], index: 2, kind: input, shape index: {}]   ;;  %s144_s3 = inlined_call_operand.vmem [shape: bf16[32,128], index: 3, kind: output, shape index: {}]  }
   0x1   :  { %v14_v0 = vld [vmem:[%s141_s0] sm:$0xff]  ;;  %v15_v1 = vld [vmem:[%s141_s0 + $0x8] sm:$0xff]  ;;  %v16_v6 = vld [vmem:[%s141_s0 + $0x10] sm:$0xff] }
   0x2   :  { %v76_v2 = vld [vmem:[%s142_s1] ss:$0 sm:$0xff]  ;;  %v17_v7 = vld [vmem:[%s141_s0 + $0x18] sm:$0xff] }
   0x3   :  { %v25_v3 = vmul.f32 %v76_v2, %v14_v0  ;;  %v26_v4 = vmul.f32 %v76_v2, %v15_v1  ;;  %v77_v5 = vld [vmem:[%s143_s2] ss:$0 sm:$0xff]  ;;  %v27_v8 = vmul.f32 %v76_v2, %v16_v6  ;;  %v28_v9 = vmul.f32 %v76_v2, %v17_v7 }
   0x5   :  { %v36_v10 = vadd.f32 %v77_v5, %v25_v3  ;;  %v37_v11 = vadd.f32 %v77_v5, %v26_v4  ;;  %v38_v12 = vadd.f32 %v77_v5, %v27_v8  ;;  %v39_v13 = vadd.f32 %v77_v5, %v28_v9 }
   0x7   :  { %vm40_vm0 = vcmp.ge.f32.partialorder %v36_v10, 0.0  ;;  %vm41_vm1 = vcmp.ge.f32.partialorder %v37_v11, 0.0  ;;  %v44_v14 = vmul.f32 0.2, %v36_v10  ;;  %v45_v15 = vmul.f32 0.2, %v37_v11 }
   0x8   :  { %vm42_vm2 = vcmp.ge.f32.partialorder %v38_v12, 0.0  ;;  %vm43_vm3 = vcmp.ge.f32.partialorder %v39_v13, 0.0  ;;  %v46_v16 = vmul.f32 0.2, %v38_v12  ;;  %v47_v17 = vmul.f32 0.2, %v39_v13 }
   0x9   :  { %v48_v18 = vsel %vm40_vm0, %v36_v10, %v44_v14  ;;  %v49_v19 = vsel %vm41_vm1, %v37_v11, %v45_v15 }
   0xa   :  { %v89_v20 = vpack.c.bf16 %v49_v19, %v48_v18  ;;  %v50_v21 = vsel %vm42_vm2, %v38_v12, %v46_v16  ;;  %v51_v22 = vsel %vm43_vm3, %v39_v13, %v47_v17 }
   0xb   :  { %v94_v23 = vpack.c.bf16 %v51_v22, %v50_v21 }
   0xc   :  { %90 = vst [vmem:[%s144_s3] sm:$0xff] %v89_v20  }
   0xd   :  { %96 = vst [vmem:[%s144_s3 + $0x8] sm:$0xff] %v94_v23  }

// kernel: discriminator_forward.15
= control target key start
LH: loop header
LB: loop body
LE: loop exit
PB: predicated region body
PF: predicated region fallthrough
CT: control target
= control target key end

     0   :  { %s1223_s1 = inlined_call_operand.vmem [shape: bf16[1024,128], index: 1, kind: input, shape index: {}]   ;;  %s1224_s0 = inlined_call_operand.vmem [shape: bf16[16,1024], index: 0, kind: input, shape index: {}]   ;;  %s1225_s2 = inlined_call_operand.vmem [shape: f32[16,128], index: 2, kind: output, shape index: {}]  }
   0x1   :  { %v914_v0 = vld [vmem:[%s1223_s1 + $0x78] sm:$0xff]   ;;  %v918_v4 = vld [vmem:[%s1223_s1 + $0x70] sm:$0xff]   ;;  %v922_v8 = vld [vmem:[%s1223_s1 + $0x68] sm:$0xff]  }
   0x2   :  { %v915_v1 = vld [vmem:[%s1223_s1 + $0xf8] sm:$0xff]   ;;  %826 = vmatprep.subr.bf16.mxu0 %v914_v0  ;;  %v919_v5 = vld [vmem:[%s1223_s1 + $0xf0] sm:$0xff]   ;;  %v923_v9 = vld [vmem:[%s1223_s1 + $0xe8] sm:$0xff]  }
   0x3   :  { %v916_v2 = vld [vmem:[%s1223_s1 + $0x38] sm:$0xff]   ;;  %848 = vmatprep.subr.bf16.mxu1 %v915_v1  ;;  %v920_v6 = vld [vmem:[%s1223_s1 + $0x30] sm:$0xff]   ;;  %v924_v10 = vld [vmem:[%s1223_s1 + $0x28] sm:$0xff]  }
   0x4   :  { %v917_v3 = vld [vmem:[%s1223_s1 + $0xb8] sm:$0xff]   ;;  %827 = vmatpush3.bf16.msra.mxu0 %v916_v2  ;;  %v921_v7 = vld [vmem:[%s1223_s1 + $0xb0] sm:$0xff]   ;;  %v925_v11 = vld [vmem:[%s1223_s1 + $0xa8] sm:$0xff]  }
   0x5   :  { %849 = vmatpush3.bf16.msra.mxu1 %v917_v3  ;;  %828 = vmatprep.subr.bf16.mxu0 %v918_v4  ;;  %v926_v12 = vld [vmem:[%s1223_s1 + $0x60] sm:$0xff]   ;;  %v930_v16 = vld [vmem:[%s1223_s1 + $0x58] sm:$0xff]   ;;  %v934_v20 = vld [vmem:[%s1223_s1 + $0x50] sm:$0xff]  }
   0x6   :  { %850 = vmatprep.subr.bf16.mxu1 %v919_v5  ;;  %v927_v13 = vld [vmem:[%s1223_s1 + $0xe0] sm:$0xff]   ;;  %v931_v17 = vld [vmem:[%s1223_s1 + $0xd8] sm:$0xff]   ;;  %v935_v21 = vld [vmem:[%s1223_s1 + $0xd0] sm:$0xff]  }
   0x7   :  { %v928_v14 = vld [vmem:[%s1223_s1 + $0x20] sm:$0xff]   ;;  %v932_v18 = vld [vmem:[%s1223_s1 + $0x18] sm:$0xff]   ;;  %v936_v22 = vld [vmem:[%s1223_s1 + $0x10] sm:$0xff]  }
   0x8   :  { %829 = vmatpush3.bf16.msra.mxu0 %v920_v6  ;;  %v929_v15 = vld [vmem:[%s1223_s1 + $0xa0] sm:$0xff]   ;;  %v933_v19 = vld [vmem:[%s1223_s1 + $0x98] sm:$0xff]   ;;  %v937_v23 = vld [vmem:[%s1223_s1 + $0x90] sm:$0xff]  }
   0x9   :  { %851 = vmatpush3.bf16.msra.mxu1 %v921_v7  ;;  %830 = vmatprep.subr.bf16.mxu0 %v922_v8  ;;  %v938_v24 = vld [vmem:[%s1223_s1 + $0x48] sm:$0xff]   ;;  %v942_v28 = vld [vmem:[%s1223_s1 + $0x40] sm:$0xff]   ;;  %v946_v40 = vld [vmem:[%s1223_s1 + $0x178] sm:$0xff]  }
   0xa   :  { %852 = vmatprep.subr.bf16.mxu1 %v923_v9  ;;  %v939_v25 = vld [vmem:[%s1223_s1 + $0xc8] sm:$0xff]   ;;  %v943_v29 = vld [vmem:[%s1223_s1 + $0xc0] sm:$0xff]   ;;  %v947_v41 = vld [vmem:[%s1223_s1 + $0x1f8] sm:$0xff]  }
   0xb   :  { %v940_v26 = vld [vmem:[%s1223_s1 + $0x8] sm:$0xff]   ;;  %v944_v30 = vld [vmem:[%s1223_s1] sm:$0xff]   ;;  %v948_v42 = vld [vmem:[%s1223_s1 + $0x138] sm:$0xff]  }
   0xc   :  { %831 = vmatpush3.bf16.msra.mxu0 %v924_v10  ;;  %v941_v27 = vld [vmem:[%s1223_s1 + $0x88] sm:$0xff]   ;;  %v945_v31 = vld [vmem:[%s1223_s1 + $0x80] sm:$0xff]   ;;  %v949_v43 = vld [vmem:[%s1223_s1 + $0x1b8] sm:$0xff]  }
   0xd   :  { %853 = vmatpush3.bf16.msra.mxu1 %v925_v11  ;;  %832 = vmatprep.subr.bf16.mxu0 %v926_v12  ;;  %v12_v32 = vld [vmem:[%s1224_s0] sm:$0xff]  ;;  %v13_v34 = vld [vmem:[%s1224_s0 + $0x8] sm:$0xff]  ;;  %v950_v44 = vld [vmem:[%s1223_s1 + $0x170] sm:$0xff]  }
   0xe   :  { %854 = vmatprep.subr.bf16.mxu1 %v927_v13  ;;  %v16_v33 = vld [vmem:[%s1224_s0 + $0x20] sm:$0xff]  ;;  %v17_v37 = vld [vmem:[%s1224_s0 + $0x28] sm:$0xff]  ;;  %v951_v45 = vld [vmem:[%s1223_s1 + $0x1f0] sm:$0xff]  }
   0xf   :  { %v754_v35 = vcombine.low %v12_v32, %v16_v33  ;;  %v755_v36 = vcombine.high %v12_v32, %v16_v33  ;;  %v756_v38 = vcombine.low %v13_v34, %v17_v37  ;;  %v757_v39 = vcombine.high %v13_v34, %v17_v37  ;;  %v952_v46 = vld [vmem:[%s1223_s1 + $0x130] sm:$0xff]   ;;  %v954_v48 = vld [vmem:[%s1223_s1 + $0x168] sm:$0xff]   ;;  %v958_v52 = vld [vmem:[%s1223_s1 + $0x160] sm:$0xff]  }
  0x10   :  { %833 = vmatpush3.bf16.msra.mxu0 %v928_v14  ;;  %v953_v47 = vld [vmem:[%s1223_s1 + $0x1b0] sm:$0xff]   ;;  %v955_v49 = vld [vmem:[%s1223_s1 + $0x1e8] sm:$0xff]   ;;  %v959_v53 = vld [vmem:[%s1223_s1 + $0x1e0] sm:$0xff]  }
  0x11   :  { %855 = vmatpush3.bf16.msra.mxu1 %v929_v15  ;;  %834 = vmatprep.subr.bf16.mxu0 %v930_v16  ;;  %v956_v50 = vld [vmem:[%s1223_s1 + $0x128] sm:$0xff]   ;;  %v960_v54 = vld [vmem:[%s1223_s1 + $0x120] sm:$0xff]   ;;  %v962_v56 = vld [vmem:[%s1223_s1 + $0x158] sm:$0xff]  }
  0x12   :  { %856 = vmatprep.subr.bf16.mxu1 %v931_v17  ;;  %604 = vmatprep.mubr.bf16.mxu0 %v755_v36  ;;  %v957_v51 = vld [vmem:[%s1223_s1 + $0x1a8] sm:$0xff]   ;;  %v961_v55 = vld [vmem:[%s1223_s1 + $0x1a0] sm:$0xff]   ;;  %v963_v57 = vld [vmem:[%s1223_s1 + $0x1d8] sm:$0xff]  }
  0x13   :  { %645 = vmatprep.mubr.bf16.mxu1 %v757_v39  ;;  %v964_v58 = vld [vmem:[%s1223_s1 + $0x118] sm:$0xff]   ;;  %v966_v60 = vld [vmem:[%s1223_s1 + $0x150] sm:$0xff]   ;;  %v970_v0 = vld [vmem:[%s1223_s1 + $0x148] sm:$0xff]  }
  0x14   :  { %835 = vmatpush3.bf16.msra.mxu0 %v932_v18  ;;  %v965_v59 = vld [vmem:[%s1223_s1 + $0x198] sm:$0xff]   ;;  %v967_v61 = vld [vmem:[%s1223_s1 + $0x1d0] sm:$0xff]   ;;  %v971_v1 = vld [vmem:[%s1223_s1 + $0x1c8] sm:$0xff]  }
  0x15   :  { %857 = vmatpush3.bf16.msra.mxu1 %v933_v19  ;;  %836 = vmatprep.subr.bf16.mxu0 %v934_v20  ;;  %v968_v62 = vld [vmem:[%s1223_s1 + $0x110] sm:$0xff]   ;;  %v972_v2 = vld [vmem:[%s1223_s1 + $0x108] sm:$0xff]   ;;  %v974_v4 = vld [vmem:[%s1223_s1 + $0x140] sm:$0xff]  }
  0x16   :  { %858 = vmatprep.subr.bf16.mxu1 %v935_v21  ;;  %v969_v63 = vld [vmem:[%s1223_s1 + $0x190] sm:$0xff]   ;;  %v973_v3 = vld [vmem:[%s1223_s1 + $0x188] sm:$0xff]   ;;  %v975_v5 = vld [vmem:[%s1223_s1 + $0x1c0] sm:$0xff]  }
  0x17   :  { %v976_v6 = vld [vmem:[%s1223_s1 + $0x100] sm:$0xff]   ;;  %v14_v8 = vld [vmem:[%s1224_s0 + $0x10] sm:$0xff]  ;;  %v15_v12 = vld [vmem:[%s1224_s0 + $0x18] sm:$0xff] }
  0x18   :  { %837 = vmatpush3.bf16.msra.mxu0 %v936_v22  ;;  %v977_v7 = vld [vmem:[%s1223_s1 + $0x180] sm:$0xff]   ;;  %v18_v9 = vld [vmem:[%s1224_s0 + $0x30] sm:$0xff]  ;;  %v19_v13 = vld [vmem:[%s1224_s0 + $0x38] sm:$0xff] }
  0x19   :  { %859 = vmatpush3.bf16.msra.mxu1 %v937_v23  ;;  %838 = vmatprep.subr.bf16.mxu0 %v938_v24  ;;  %v758_v10 = vcombine.low %v14_v8, %v18_v9  ;;  %v759_v11 = vcombine.high %v14_v8, %v18_v9  ;;  %v760_v14 = vcombine.low %v15_v12, %v19_v13 }
  0x1a   :  { %860 = vmatprep.subr.bf16.mxu1 %v939_v25  ;;  %v761_v15 = vcombine.high %v15_v12, %v19_v13 }
  0x1c   :  { %839 = vmatpush3.bf16.msra.mxu0 %v940_v26 }
  0x1d   :  { %861 = vmatpush3.bf16.msra.mxu1 %v941_v27  ;;  %840 = vmatprep.subr.bf16.mxu0 %v942_v28 }
  0x1e   :  { %862 = vmatprep.subr.bf16.mxu1 %v943_v29 }
  0x20   :  { %841 = vmatpush3.bf16.msra.mxu0 %v944_v30 }
  0x21   :  { %863 = vmatpush3.bf16.msra.mxu1 %v945_v31  ;;  %870 = vmatprep.subr.bf16.mxu0 %v946_v40 }
  0x22   :  { %892 = vmatprep.subr.bf16.mxu1 %v947_v41 }
  0x23   :  { %605 = vmatmul.mubr.bf16.vlgmr.msra.gmra.mxu0 %v754_v35 }
  0x24   :  { %646 = vmatmul.mubr.bf16.vlgmr.msra.gmra.mxu1 %v756_v38  ;;  %871 = vmatpush3.bf16.msra.mxu0 %v948_v42 }
  0x25   :  { %893 = vmatpush3.bf16.msra.mxu1 %v949_v43  ;;  %872 = vmatprep.subr.bf16.mxu0 %v950_v44 }
  0x26   :  { %894 = vmatprep.subr.bf16.mxu1 %v951_v45  ;;  %686 = vmatprep.mubr.bf16.mxu0 %v759_v11 }
  0x27   :  { %727 = vmatprep.mubr.bf16.mxu1 %v761_v15 }
  0x28   :  { %873 = vmatpush3.bf16.msra.mxu0 %v952_v46 }
  0x29   :  { %895 = vmatpush3.bf16.msra.mxu1 %v953_v47  ;;  %874 = vmatprep.subr.bf16.mxu0 %v954_v48 }
  0x2a   :  { %896 = vmatprep.subr.bf16.mxu1 %v955_v49 }
  0x2c   :  { %875 = vmatpush3.bf16.msra.mxu0 %v956_v50 }
  0x2d   :  { %897 = vmatpush3.bf16.msra.mxu1 %v957_v51  ;;  %876 = vmatprep.subr.bf16.mxu0 %v958_v52 }
  0x2e   :  { %898 = vmatprep.subr.bf16.mxu1 %v959_v53 }
  0x30   :  { %877 = vmatpush3.bf16.msra.mxu0 %v960_v54 }
  0x31   :  { %899 = vmatpush3.bf16.msra.mxu1 %v961_v55  ;;  %878 = vmatprep.subr.bf16.mxu0 %v962_v56 }
  0x32   :  { %900 = vmatprep.subr.bf16.mxu1 %v963_v57 }
  0x34   :  { %879 = vmatpush3.bf16.msra.mxu0 %v964_v58 }
  0x35   :  { %901 = vmatpush3.bf16.msra.mxu1 %v965_v59  ;;  %880 = vmatprep.subr.bf16.mxu0 %v966_v60 }
  0x36   :  { %902 = vmatprep.subr.bf16.mxu1 %v967_v61 }
  0x38   :  { %881 = vmatpush3.bf16.msra.mxu0 %v968_v62 }
  0x39   :  { %903 = vmatpush3.bf16.msra.mxu1 %v969_v63  ;;  %882 = vmatprep.subr.bf16.mxu0 %v970_v0 }
  0x3a   :  { %904 = vmatprep.subr.bf16.mxu1 %v971_v1 }
  0x3c   :  { %883 = vmatpush3.bf16.msra.mxu0 %v972_v2 }
  0x3d   :  { %905 = vmatpush3.bf16.msra.mxu1 %v973_v3  ;;  %884 = vmatprep.subr.bf16.mxu0 %v974_v4 }
  0x3e   :  { %906 = vmatprep.subr.bf16.mxu1 %v975_v5 }
  0x40   :  { %885 = vmatpush3.bf16.msra.mxu0 %v976_v6 }
  0x41   :  { %907 = vmatpush3.bf16.msra.mxu1 %v977_v7 }
  0x43   :  { %687 = vmatmul.mubr.bf16.vlgmr.msra.gmra.mxu0 %v758_v10 }
  0x44   :  { %728 = vmatmul.mubr.bf16.vlgmr.msra.gmra.mxu1 %v760_v14 }
  0xe3   :  { %v842_v16 = vpop.f32.mrf.mxu0 }
  0xe4   :  { %v864_v17 = vpop.f32.mrf.mxu1 }
  0xe5   :  { %v843_v18 = vpop.f32.mrf.mxu0 }
  0xe6   :  { %v865_v19 = vpop.f32.mrf.mxu1  ;;  %v844_v23 = vadd.f32 %v843_v18, %v842_v16 }
  0xe7   :  { %v845_v20 = vpop.f32.mrf.mxu0  ;;  %v866_v24 = vadd.f32 %v865_v19, %v864_v17 }
  0xe8   :  { %v867_v21 = vpop.f32.mrf.mxu1 }
  0xe9   :  { %v846_v22 = vpop.f32.mrf.mxu0  ;;  %v648_v29 = vadd.f32 %v866_v24, %v844_v23 }
  0xea   :  { %v868_v25 = vpop.f32.mrf.mxu1  ;;  %v847_v30 = vadd.f32 %v846_v22, %v845_v20 }
  0xeb   :  { %v869_v31 = vadd.f32 %v868_v25, %v867_v21 }
  0xed   :  { %v651_v39 = vadd.f32 %v869_v31, %v847_v30 }
 0x103   :  { %v886_v26 = vpop.f32.mrf.mxu0 }
 0x104   :  { %v908_v27 = vpop.f32.mrf.mxu1 }
 0x105   :  { %v887_v28 = vpop.f32.mrf.mxu0 }
 0x106   :  { %v888_v32 = vadd.f32 %v887_v28, %v886_v26  ;;  %v909_v33 = vpop.f32.mrf.mxu1 }
 0x107   :  { %v889_v34 = vpop.f32.mrf.mxu0  ;;  %v910_v36 = vadd.f32 %v909_v33, %v908_v27 }
 0x108   :  { %v689_v35 = vadd.f32 %v888_v32, %v648_v29  ;;  %v911_v37 = vpop.f32.mrf.mxu1 }
 0x109   :  { %v890_v38 = vpop.f32.mrf.mxu0 }
 0x10a   :  { %v730_v40 = vadd.f32 %v910_v36, %v689_v35  ;;  %v891_v41 = vadd.f32 %v890_v38, %v889_v34  ;;  %v912_v42 = vpop.f32.mrf.mxu1 }
 0x10b   :  { %v913_v45 = vadd.f32 %v912_v42, %v911_v37 }
 0x10c   :  { %v736_v43 = vsub.f32 0.0, %v730_v40  ;;  %v692_v44 = vadd.f32 %v891_v41, %v651_v39 }
 0x10e   :  { %v738_v46 = vmul.f32 1.442695, %v736_v43  ;;  %v733_v47 = vadd.f32 %v913_v45, %v692_v44 }
 0x110   :  { %978 = vpow2.f32 %v738_v46  ;;  %v737_v48 = vsub.f32 0.0, %v733_v47 }
 0x112   :  { %v740_v49 = vmul.f32 1.442695, %v737_v48 }
 0x114   :  { %980 = vpow2.f32 %v740_v49 }
 0x11d   :  { %v979_v50 = vpop.eup %978 }
 0x11e   :  { %v742_v51 = vadd.f32 1.0, %v979_v50 }
 0x120   :  { %982 = vrcp.f32 %v742_v51 }
 0x121   :  { %v981_v52 = vpop.eup %980 }
 0x122   :  { %v743_v53 = vadd.f32 1.0, %v981_v52 }
 0x124   :  { %984 = vrcp.f32 %v743_v53 }
 0x12d   :  { %v983_v54 = vpop.eup %982 }
 0x12e   :  { %748 = vst [vmem:[%s1225_s2] sm:$0xff] %v983_v54 }
 0x131   :  { %v985_v55 = vpop.eup %984 }
 0x132   :  { %749 = vst [vmem:[%s1225_s2 + $0x8] sm:$0xff] %v985_v55 }

</bundles_post_ra>
